<compile_context>
chip_gen: v7x
topology: tpu7x:2x2x1
jax: 0.10.0
libtpu: 0.0.40
codegen_flags: <defaults>
</compile_context>

<pallas_src>
import functools
import math

import jax
import jax.numpy as jnp
from jax import lax
from jax.experimental import pallas as pl
from jax.experimental.pallas import tpu as pltpu

# ----------------------------- model dims (small, consistent with module) ----
B, S, H = 2, 8, 64          # batch, seq, hidden
NUM_HEADS = 4
HEAD_DIM = H // NUM_HEADS
INTER = 128                 # intermediate (FFN) size
GATE_HID = 512              # hardcoded in the torch module
LN_EPS = 1e-12              # BertConfig.layer_norm_eps
SLAB_W = 256                # lane width of packed QKV weights / bias slab


def _gelu_exact(x):
    # HF BERT "gelu" = erf-based gelu
    return x * 0.5 * (1.0 + lax.erf(x * (1.0 / math.sqrt(2.0))))


def _layernorm(x, gamma, beta, eps=LN_EPS):
    # two-pass (centered) variance: robust to |mean| >> std
    mu = jnp.mean(x, axis=-1, keepdims=True)
    xc = x - mu
    var = jnp.mean(xc * xc, axis=-1, keepdims=True)
    return xc * lax.rsqrt(var + eps) * gamma + beta


# ------------------------------------------------- fused gate + layer kernel -
def moe_layer_kernel(num_heads, head_dim,
                     x_ref, amask_ref,
                     gw1_ref, gw2d_ref, gb_ref,
                     wqkv_ref, wo_ref, wi_ref, wo2_ref, bias_ref,
                     out_ref):
    x2 = x_ref[...]                                   # [B*S, H]  f32
    amask = amask_ref[...]                            # [B*S, B*S] additive mask

    # ---- gate: relu(cls0 @ W1 + b1); pick expert2 iff logit1 > logit0 -------
    # softmax is monotone so argmax(softmax(logits)) == argmax(logits); the
    # decision is computed as a logit difference on the VPU (no tiny-N matmul).
    gb = gb_ref[...]                                  # [2, 512] (row0=b1, row1[0]=b2[1]-b2[0])
    cls0 = x2[0:1, :]                                 # CLS of batch 0 (only row used by torch argmax)
    g1 = jnp.maximum(
        jnp.dot(cls0, gw1_ref[...], preferred_element_type=jnp.float32) + gb[0:1, :],
        0.0)                                          # [1, 512]
    diff = jnp.sum(g1 * gw2d_ref[...], axis=-1, keepdims=True) + gb[1:2, 0:1]   # [1,1]
    w_sel = (diff > 0.0).astype(jnp.float32)          # 1.0 -> expert index 1

    # Exact select between the two resident experts (w_sel is exactly 0.0/1.0).
    def sel(ref):
        return w_sel * ref[1] + (1.0 - w_sel) * ref[0]

    wqkv = sel(wqkv_ref)                              # [H, 256]  (q block pre-scaled by 1/sqrt(hd))
    wo = sel(wo_ref)                                  # [H, H]
    wi = sel(wi_ref)                                  # [H, INTER]
    wo2 = sel(wo2_ref)                                # [INTER, H]
    bias = sel(bias_ref)                              # [8, 256]

    h = num_heads * head_dim
    inter = wi.shape[1]
    bo = bias[1:2, 0:h]
    bi = bias[2:3, 0:inter]
    bo2 = bias[3:4, 0:h]
    ln1g, ln1b = bias[4:5, 0:h], bias[5:6, 0:h]
    ln2g, ln2b = bias[6:7, 0:h], bias[7:8, 0:h]

    # ---- fused lane-dense QKV: one [B*S,H] @ [H,256] matmul -----------------
    qkv = jnp.dot(x2, wqkv, preferred_element_type=jnp.float32) + bias[0:1, :]   # [B*S, 256]
    q = qkv[:, 0:h]
    k = qkv[:, h:2 * h]
    v = qkv[:, 2 * h:3 * h]

    # ---- attention: all B*S rows at once per head (block-diag additive mask) -
    ctx_heads = []
    for hi in range(num_heads):                       # static, NUM_HEADS=4
        lo = hi * head_dim
        qh = q[:, lo:lo + head_dim]                   # [B*S, HD] (scale already folded)
        kh = k[:, lo:lo + head_dim]
        vh = v[:, lo:lo + head_dim]
        s = jnp.einsum("qd,kd->qk", qh, kh,
                       preferred_element_type=jnp.float32) + amask
        m = jnp.max(s, axis=-1, keepdims=True)
        e = jnp.exp(s - m)
        p = e * pl.reciprocal(jnp.sum(e, axis=-1, keepdims=True), approx=True)
        ctx_heads.append(jnp.dot(p, vh, preferred_element_type=jnp.float32))
    ctx = jnp.concatenate(ctx_heads, axis=-1)         # [B*S, H]  lane concat

    attn = jnp.dot(ctx, wo, preferred_element_type=jnp.float32) + bo
    h1 = _layernorm(attn + x2, ln1g, ln1b)

    ff = _gelu_exact(jnp.dot(h1, wi, preferred_element_type=jnp.float32) + bi)
    ff2 = jnp.dot(ff, wo2, preferred_element_type=jnp.float32) + bo2
    out_ref[...] = _layernorm(ff2 + h1, ln2g, ln2b)
    # TODO(synk): dropout layers are identity in eval mode, so intentionally omitted.


def run_moe_layer(hidden, attention_mask, gate_packed, experts):
    """hidden: [B,S,H]; attention_mask: [B,S] raw additive; packed params."""
    Bv, Sv, Hv = hidden.shape
    BS = Bv * Sv
    x2 = hidden.reshape(BS, Hv).astype(jnp.float32)

    # Combined additive mask: raw attention_mask per flattened key (broadcast
    # over heads & query rows, as torch does) + block-diagonal -1e30 so rows
    # from different batches never attend to each other.
    m = attention_mask.astype(jnp.float32).reshape(1, BS)
    bid = jnp.arange(BS, dtype=jnp.int32) // Sv
    same = bid[:, None] == bid[None, :]
    amask = jnp.where(same, m, jnp.float32(-1e30))    # [BS, BS]

    args = (x2, amask,
            gate_packed["w1"], gate_packed["w2d"], gate_packed["bias"],
            experts["wqkv"], experts["wo"], experts["wi"], experts["wo2"],
            experts["bias"])

    def fullspec(a):
        nd = a.ndim
        def imap(i):
            return (0,) * nd
        return pl.BlockSpec(a.shape, imap)

    kern = functools.partial(moe_layer_kernel, NUM_HEADS, HEAD_DIM)
    out2 = pl.pallas_call(
        kern,
        out_shape=jax.ShapeDtypeStruct((BS, Hv), jnp.float32),
        grid=(1,),                                    # single invocation
        in_specs=[fullspec(a) for a in args],
        out_specs=pl.BlockSpec((BS, Hv), lambda i: (0, 0)),
        compiler_params=pltpu.CompilerParams(dimension_semantics=("arbitrary",)),
    )(*args)
    return out2.reshape(Bv, Sv, Hv)


# --------------------------------------------- weight packing (done ONCE) ----
def pack_expert(p):
    """Lane-dense, kernel-friendly slabs for one expert."""
    scale = 1.0 / math.sqrt(HEAD_DIM)

    wqkv = jnp.concatenate([p["wq"] * scale, p["wk"], p["wv"]], axis=1)   # [H, 3H]
    wqkv = jnp.pad(wqkv, ((0, 0), (0, SLAB_W - 3 * H)))                   # [H, 256]

    def row(vec):
        v = vec.reshape(1, -1)
        return jnp.pad(v, ((0, 0), (0, SLAB_W - v.shape[1])))

    bias = jnp.concatenate([
        row(jnp.concatenate([p["bq"] * scale, p["bk"], p["bv"]])),        # row 0: bqkv (192)
        row(p["bo"]),                                                     # row 1
        row(p["bi"]),                                                     # row 2
        row(p["bo2"]),                                                    # row 3
        row(p["ln1_g"]), row(p["ln1_b"]),                                 # rows 4,5
        row(p["ln2_g"]), row(p["ln2_b"]),                                 # rows 6,7
    ], axis=0)                                                            # [8, 256]

    return {"wqkv": wqkv, "wo": p["wo"], "wi": p["wi"], "wo2": p["wo2"],
            "bias": bias}


def stack_experts(e1, e2):
    """Stack expert1/expert2 as leading-dim-2 arrays ONCE (no per-call copies)."""
    p1, p2 = pack_expert(e1), pack_expert(e2)
    return jax.tree_util.tree_map(lambda a, b: jnp.stack([a, b]), p1, p2)


def pack_gate(gp):
    """Gate packed so the expert decision is a VPU dot + compare in-kernel."""
    w2d = (gp["w2"][:, 1] - gp["w2"][:, 0]).reshape(1, GATE_HID)          # [1, 512]
    b2d = gp["b2"][1] - gp["b2"][0]
    row1 = jnp.zeros((GATE_HID,), jnp.float32).at[0].set(b2d)
    gbias = jnp.stack([gp["b1"], row1])                                   # [2, 512]
    return {"w1": gp["w1"], "w2d": w2d, "bias": gbias}


# ------------------------------------------------------------ MoE forward ----
@jax.jit
def bert_moe_forward(inputs, attention_mask, gate_packed, stacked_experts):
    hidden = inputs[0]                                 # [B, S, H]
    return run_moe_layer(hidden, attention_mask, gate_packed, stacked_experts)


# -------------------------------------------------------------- reference ----
def _bert_layer_ref(x, mask, p):
    q = x @ p["wq"] + p["bq"]
    k = x @ p["wk"] + p["bk"]
    v = x @ p["wv"] + p["bv"]

    def split(t):
        return t.reshape(B, S, NUM_HEADS, HEAD_DIM).transpose(0, 2, 1, 3)

    qh, kh, vh = split(q), split(k), split(v)
    scores = jnp.einsum("bhqd,bhkd->bhqk", qh, kh) / math.sqrt(HEAD_DIM)
    scores = scores + mask[:, None, None, :]
    probs = jax.nn.softmax(scores, axis=-1)
    ctx = jnp.einsum("bhqk,bhkd->bhqd", probs, vh).transpose(0, 2, 1, 3).reshape(B, S, H)
    attn = ctx @ p["wo"] + p["bo"]
    mu = jnp.mean(attn + x, axis=-1, keepdims=True)
    var = jnp.mean(((attn + x) - mu) ** 2, axis=-1, keepdims=True)
    h1 = ((attn + x) - mu) * lax.rsqrt(var + LN_EPS) * p["ln1_g"] + p["ln1_b"]
    ff = _gelu_exact(h1 @ p["wi"] + p["bi"])
    ff2 = ff @ p["wo2"] + p["bo2"]
    mu2 = jnp.mean(ff2 + h1, axis=-1, keepdims=True)
    var2 = jnp.mean(((ff2 + h1) - mu2) ** 2, axis=-1, keepdims=True)
    return ((ff2 + h1) - mu2) * lax.rsqrt(var2 + LN_EPS) * p["ln2_g"] + p["ln2_b"]


def _forward_ref(inputs, attention_mask, gp, e1, e2):
    hidden = inputs[0]
    cls = hidden[:, 0, :]
    h = jnp.maximum(cls @ gp["w1"] + gp["b1"], 0.0)
    gate_out = jax.nn.softmax(h @ gp["w2"] + gp["b2"], axis=-1)
    gate_index = jnp.argmax(gate_out[0], axis=0)
    stacked = jax.tree_util.tree_map(lambda a, b: jnp.stack([a, b]), e1, e2)
    sel = jax.tree_util.tree_map(lambda s: s[gate_index], stacked)
    return _bert_layer_ref(hidden, attention_mask.astype(jnp.float32), sel)


# ------------------------------------------------------------------- init ----
def init_expert(key):
    ks = jax.random.split(key, 12)
    n = lambda k, shape: (0.02 * jax.random.normal(k, shape, jnp.float32))
    return {
        "wq": n(ks[0], (H, H)),   "bq": n(ks[1], (H,)),
        "wk": n(ks[2], (H, H)),   "bk": n(ks[3], (H,)),
        "wv": n(ks[4], (H, H)),   "bv": n(ks[5], (H,)),
        "wo": n(ks[6], (H, H)),   "bo": n(ks[7], (H,)),
        "ln1_g": jnp.ones((H,), jnp.float32), "ln1_b": jnp.zeros((H,), jnp.float32),
        "wi": n(ks[8], (H, INTER)),  "bi": n(ks[9], (INTER,)),
        "wo2": n(ks[10], (INTER, H)), "bo2": n(ks[11], (H,)),
        "ln2_g": jnp.ones((H,), jnp.float32), "ln2_b": jnp.zeros((H,), jnp.float32),
    }


def init_gate(key):
    ks = jax.random.split(key, 4)
    n = lambda k, shape: (0.02 * jax.random.normal(k, shape, jnp.float32))
    return {
        "w1": n(ks[0], (H, GATE_HID)), "b1": n(ks[1], (GATE_HID,)),
        "w2": n(ks[2], (GATE_HID, 2)), "b2": n(ks[3], (2,)),
    }


# ------------------------------------------------------------------- main ----
if __name__ == "__main__":
    key = jax.random.PRNGKey(0)
    k_hidden, k_g, k_e1, k_e2 = jax.random.split(key, 4)

    hidden_states = jax.random.normal(k_hidden, (B, S, H), jnp.float32)
    attention_mask = jnp.ones((B, S), jnp.float32)    # raw additive mask (as in the module)

    gate_params = init_gate(k_g)
    expert1 = init_expert(k_e1)
    expert2 = init_expert(k_e2)

    gate_packed = pack_gate(gate_params)              # packed ONCE
    stacked = stack_experts(expert1, expert2)         # packed + stacked ONCE

    out = bert_moe_forward((hidden_states,), attention_mask, gate_packed, stacked)
    out = jax.block_until_ready(out)

    ref = _forward_ref((hidden_states,), attention_mask, gate_params, expert1, expert2)
    assert out.shape == (B, S, H)
    assert bool(jnp.isfinite(out).all())
    assert bool(jnp.allclose(out, ref, atol=2e-2, rtol=2e-2)), \
        f"max abs diff {float(jnp.max(jnp.abs(out - ref)))}"

    print("KERNEL_OK")
</pallas_src>

<mosaic_0001>
module attributes {stable_mosaic.version = 11 : i64} {
  func.func @moe_layer_kernel(%arg0: i32, %arg1: memref<16x64xf32, #tpu.memory_space<vmem>>, %arg2: memref<16x16xf32, #tpu.memory_space<vmem>>, %arg3: memref<64x512xf32, #tpu.memory_space<vmem>>, %arg4: memref<1x512xf32, #tpu.memory_space<vmem>>, %arg5: memref<2x512xf32, #tpu.memory_space<vmem>>, %arg6: memref<2x64x256xf32, #tpu.memory_space<vmem>>, %arg7: memref<2x64x64xf32, #tpu.memory_space<vmem>>, %arg8: memref<2x64x128xf32, #tpu.memory_space<vmem>>, %arg9: memref<2x128x64xf32, #tpu.memory_space<vmem>>, %arg10: memref<2x8x256xf32, #tpu.memory_space<vmem>>, %arg11: memref<16x64xf32, #tpu.memory_space<vmem>>) attributes {dimension_semantics = [#tpu.dimension_semantics<arbitrary>], iteration_bounds = array<i64: 1>, scalar_prefetch = 0 : i64, scratch_operands = 0 : i64, tpu.core_type = #tpu.core_type<tc>, window_params = [{pipeline_mode = #tpu.pipeline_mode<synchronous>, transform_indices = @transform_0, window_bounds = array<i64: 16, 64>}, {pipeline_mode = #tpu.pipeline_mode<synchronous>, transform_indices = @transform_1, window_bounds = array<i64: 16, 16>}, {pipeline_mode = #tpu.pipeline_mode<synchronous>, transform_indices = @transform_2, window_bounds = array<i64: 64, 512>}, {pipeline_mode = #tpu.pipeline_mode<synchronous>, transform_indices = @transform_3, window_bounds = array<i64: 1, 512>}, {pipeline_mode = #tpu.pipeline_mode<synchronous>, transform_indices = @transform_4, window_bounds = array<i64: 2, 512>}, {pipeline_mode = #tpu.pipeline_mode<synchronous>, transform_indices = @transform_5, window_bounds = array<i64: 2, 64, 256>}, {pipeline_mode = #tpu.pipeline_mode<synchronous>, transform_indices = @transform_6, window_bounds = array<i64: 2, 64, 64>}, {pipeline_mode = #tpu.pipeline_mode<synchronous>, transform_indices = @transform_7, window_bounds = array<i64: 2, 64, 128>}, {pipeline_mode = #tpu.pipeline_mode<synchronous>, transform_indices = @transform_8, window_bounds = array<i64: 2, 128, 64>}, {pipeline_mode = #tpu.pipeline_mode<synchronous>, transform_indices = @transform_9, window_bounds = array<i64: 2, 8, 256>}, {pipeline_mode = #tpu.pipeline_mode<synchronous>, transform_indices = @transform_10, window_bounds = array<i64: 16, 64>}]} {
    %c0 = arith.constant 0 : index
    %c0_0 = arith.constant 0 : index
    %0 = vector.load %arg1[%c0, %c0_0] : memref<16x64xf32, #tpu.memory_space<vmem>>, vector<16x64xf32>
    %c0_1 = arith.constant 0 : index
    %c0_2 = arith.constant 0 : index
    %1 = vector.load %arg2[%c0_1, %c0_2] : memref<16x16xf32, #tpu.memory_space<vmem>>, vector<16x16xf32>
    %c0_3 = arith.constant 0 : index
    %c0_4 = arith.constant 0 : index
    %2 = vector.load %arg5[%c0_3, %c0_4] : memref<2x512xf32, #tpu.memory_space<vmem>>, vector<2x512xf32>
    %3 = vector.extract_strided_slice %0 {offsets = [0, 0], sizes = [1, 64], strides = [1, 1]} : vector<16x64xf32> to vector<1x64xf32>
    %c0_5 = arith.constant 0 : index
    %c0_6 = arith.constant 0 : index
    %4 = vector.load %arg3[%c0_5, %c0_6] : memref<64x512xf32, #tpu.memory_space<vmem>>, vector<64x512xf32>
    %cst = arith.constant dense<0.000000e+00> : vector<1x512xf32>
    %5 = tpu.matmul %3, %4, %cst {dimension_numbers = #tpu.dot_dimension_numbers<[1], [0], [0], [1], [0, 0, 1, 1], [], []>} : vector<1x64xf32>, vector<64x512xf32>, vector<1x512xf32> -> vector<1x512xf32>
    %6 = vector.extract_strided_slice %2 {offsets = [0, 0], sizes = [1, 512], strides = [1, 1]} : vector<2x512xf32> to vector<1x512xf32>
    %7 = arith.addf %5, %6 : vector<1x512xf32>
    %cst_7 = arith.constant 0.000000e+00 : f32
    %8 = vector.broadcast %cst_7 : f32 to vector<1x512xf32>
    %9 = arith.maximumf %7, %8 : vector<1x512xf32>
    %c0_8 = arith.constant 0 : index
    %c0_9 = arith.constant 0 : index
    %10 = vector.load %arg4[%c0_8, %c0_9] : memref<1x512xf32, #tpu.memory_space<vmem>>, vector<1x512xf32>
    %11 = arith.mulf %9, %10 : vector<1x512xf32>
    %cst_10 = arith.constant dense<0.000000e+00> : vector<1xf32>
    %12 = vector.multi_reduction <add>, %11, %cst_10 [1] : vector<1x512xf32> to vector<1xf32>
    %13 = vector.shape_cast %12 : vector<1xf32> to vector<1x1xf32>
    %14 = vector.extract_strided_slice %2 {offsets = [1, 0], sizes = [1, 1], strides = [1, 1]} : vector<2x512xf32> to vector<1x1xf32>
    %15 = arith.addf %13, %14 : vector<1x1xf32>
    %cst_11 = arith.constant 0.000000e+00 : f32
    %16 = vector.broadcast %cst_11 : f32 to vector<1x1xf32>
    %17 = arith.cmpf ogt, %15, %16 : vector<1x1xf32>
    %18 = arith.extui %17 : vector<1x1xi1> to vector<1x1xi32>
    %19 = arith.sitofp %18 : vector<1x1xi32> to vector<1x1xf32>
    %c1 = arith.constant 1 : index
    %c0_12 = arith.constant 0 : index
    %c0_13 = arith.constant 0 : index
    %20 = vector.load %arg6[%c1, %c0_12, %c0_13] : memref<2x64x256xf32, #tpu.memory_space<vmem>>, vector<1x64x256xf32>
    %21 = vector.shape_cast %20 : vector<1x64x256xf32> to vector<64x256xf32>
    %22 = vector.broadcast %19 : vector<1x1xf32> to vector<64x256xf32>
    %23 = arith.mulf %22, %21 : vector<64x256xf32>
    %cst_14 = arith.constant 1.000000e+00 : f32
    %24 = vector.broadcast %cst_14 : f32 to vector<1x1xf32>
    %25 = arith.subf %24, %19 : vector<1x1xf32>
    %c0_15 = arith.constant 0 : index
    %c0_16 = arith.constant 0 : index
    %c0_17 = arith.constant 0 : index
    %26 = vector.load %arg6[%c0_15, %c0_16, %c0_17] : memref<2x64x256xf32, #tpu.memory_space<vmem>>, vector<1x64x256xf32>
    %27 = vector.shape_cast %26 : vector<1x64x256xf32> to vector<64x256xf32>
    %28 = vector.broadcast %25 : vector<1x1xf32> to vector<64x256xf32>
    %29 = arith.mulf %28, %27 : vector<64x256xf32>
    %30 = arith.addf %23, %29 : vector<64x256xf32>
    %c1_18 = arith.constant 1 : index
    %c0_19 = arith.constant 0 : index
    %c0_20 = arith.constant 0 : index
    %31 = vector.load %arg7[%c1_18, %c0_19, %c0_20] : memref<2x64x64xf32, #tpu.memory_space<vmem>>, vector<1x64x64xf32>
    %32 = vector.shape_cast %31 : vector<1x64x64xf32> to vector<64x64xf32>
    %33 = vector.broadcast %19 : vector<1x1xf32> to vector<64x64xf32>
    %34 = arith.mulf %33, %32 : vector<64x64xf32>
    %cst_21 = arith.constant 1.000000e+00 : f32
    %35 = vector.broadcast %cst_21 : f32 to vector<1x1xf32>
    %36 = arith.subf %35, %19 : vector<1x1xf32>
    %c0_22 = arith.constant 0 : index
    %c0_23 = arith.constant 0 : index
    %c0_24 = arith.constant 0 : index
    %37 = vector.load %arg7[%c0_22, %c0_23, %c0_24] : memref<2x64x64xf32, #tpu.memory_space<vmem>>, vector<1x64x64xf32>
    %38 = vector.shape_cast %37 : vector<1x64x64xf32> to vector<64x64xf32>
    %39 = vector.broadcast %36 : vector<1x1xf32> to vector<64x64xf32>
    %40 = arith.mulf %39, %38 : vector<64x64xf32>
    %41 = arith.addf %34, %40 : vector<64x64xf32>
    %c1_25 = arith.constant 1 : index
    %c0_26 = arith.constant 0 : index
    %c0_27 = arith.constant 0 : index
    %42 = vector.load %arg8[%c1_25, %c0_26, %c0_27] : memref<2x64x128xf32, #tpu.memory_space<vmem>>, vector<1x64x128xf32>
    %43 = vector.shape_cast %42 : vector<1x64x128xf32> to vector<64x128xf32>
    %44 = vector.broadcast %19 : vector<1x1xf32> to vector<64x128xf32>
    %45 = arith.mulf %44, %43 : vector<64x128xf32>
    %cst_28 = arith.constant 1.000000e+00 : f32
    %46 = vector.broadcast %cst_28 : f32 to vector<1x1xf32>
    %47 = arith.subf %46, %19 : vector<1x1xf32>
    %c0_29 = arith.constant 0 : index
    %c0_30 = arith.constant 0 : index
    %c0_31 = arith.constant 0 : index
    %48 = vector.load %arg8[%c0_29, %c0_30, %c0_31] : memref<2x64x128xf32, #tpu.memory_space<vmem>>, vector<1x64x128xf32>
    %49 = vector.shape_cast %48 : vector<1x64x128xf32> to vector<64x128xf32>
    %50 = vector.broadcast %47 : vector<1x1xf32> to vector<64x128xf32>
    %51 = arith.mulf %50, %49 : vector<64x128xf32>
    %52 = arith.addf %45, %51 : vector<64x128xf32>
    %c1_32 = arith.constant 1 : index
    %c0_33 = arith.constant 0 : index
    %c0_34 = arith.constant 0 : index
    %53 = vector.load %arg9[%c1_32, %c0_33, %c0_34] : memref<2x128x64xf32, #tpu.memory_space<vmem>>, vector<1x128x64xf32>
    %54 = vector.shape_cast %53 : vector<1x128x64xf32> to vector<128x64xf32>
    %55 = vector.broadcast %19 : vector<1x1xf32> to vector<128x64xf32>
    %56 = arith.mulf %55, %54 : vector<128x64xf32>
    %cst_35 = arith.constant 1.000000e+00 : f32
    %57 = vector.broadcast %cst_35 : f32 to vector<1x1xf32>
    %58 = arith.subf %57, %19 : vector<1x1xf32>
    %c0_36 = arith.constant 0 : index
    %c0_37 = arith.constant 0 : index
    %c0_38 = arith.constant 0 : index
    %59 = vector.load %arg9[%c0_36, %c0_37, %c0_38] : memref<2x128x64xf32, #tpu.memory_space<vmem>>, vector<1x128x64xf32>
    %60 = vector.shape_cast %59 : vector<1x128x64xf32> to vector<128x64xf32>
    %61 = vector.broadcast %58 : vector<1x1xf32> to vector<128x64xf32>
    %62 = arith.mulf %61, %60 : vector<128x64xf32>
    %63 = arith.addf %56, %62 : vector<128x64xf32>
    %c1_39 = arith.constant 1 : index
    %c0_40 = arith.constant 0 : index
    %c0_41 = arith.constant 0 : index
    %64 = vector.load %arg10[%c1_39, %c0_40, %c0_41] : memref<2x8x256xf32, #tpu.memory_space<vmem>>, vector<1x8x256xf32>
    %65 = vector.shape_cast %64 : vector<1x8x256xf32> to vector<8x256xf32>
    %66 = vector.broadcast %19 : vector<1x1xf32> to vector<8x256xf32>
    %67 = arith.mulf %66, %65 : vector<8x256xf32>
    %cst_42 = arith.constant 1.000000e+00 : f32
    %68 = vector.broadcast %cst_42 : f32 to vector<1x1xf32>
    %69 = arith.subf %68, %19 : vector<1x1xf32>
    %c0_43 = arith.constant 0 : index
    %c0_44 = arith.constant 0 : index
    %c0_45 = arith.constant 0 : index
    %70 = vector.load %arg10[%c0_43, %c0_44, %c0_45] : memref<2x8x256xf32, #tpu.memory_space<vmem>>, vector<1x8x256xf32>
    %71 = vector.shape_cast %70 : vector<1x8x256xf32> to vector<8x256xf32>
    %72 = vector.broadcast %69 : vector<1x1xf32> to vector<8x256xf32>
    %73 = arith.mulf %72, %71 : vector<8x256xf32>
    %74 = arith.addf %67, %73 : vector<8x256xf32>
    %75 = vector.extract_strided_slice %74 {offsets = [1, 0], sizes = [1, 64], strides = [1, 1]} : vector<8x256xf32> to vector<1x64xf32>
    %76 = vector.extract_strided_slice %74 {offsets = [2, 0], sizes = [1, 128], strides = [1, 1]} : vector<8x256xf32> to vector<1x128xf32>
    %77 = vector.extract_strided_slice %74 {offsets = [3, 0], sizes = [1, 64], strides = [1, 1]} : vector<8x256xf32> to vector<1x64xf32>
    %78 = vector.extract_strided_slice %74 {offsets = [4, 0], sizes = [1, 64], strides = [1, 1]} : vector<8x256xf32> to vector<1x64xf32>
    %79 = vector.extract_strided_slice %74 {offsets = [5, 0], sizes = [1, 64], strides = [1, 1]} : vector<8x256xf32> to vector<1x64xf32>
    %80 = vector.extract_strided_slice %74 {offsets = [6, 0], sizes = [1, 64], strides = [1, 1]} : vector<8x256xf32> to vector<1x64xf32>
    %81 = vector.extract_strided_slice %74 {offsets = [7, 0], sizes = [1, 64], strides = [1, 1]} : vector<8x256xf32> to vector<1x64xf32>
    %cst_46 = arith.constant dense<0.000000e+00> : vector<16x256xf32>
    %82 = tpu.matmul %0, %30, %cst_46 {dimension_numbers = #tpu.dot_dimension_numbers<[1], [0], [0], [1], [0, 0, 1, 1], [], []>} : vector<16x64xf32>, vector<64x256xf32>, vector<16x256xf32> -> vector<16x256xf32>
    %83 = vector.extract_strided_slice %74 {offsets = [0, 0], sizes = [1, 256], strides = [1, 1]} : vector<8x256xf32> to vector<1x256xf32>
    %84 = vector.broadcast %83 : vector<1x256xf32> to vector<16x256xf32>
    %85 = arith.addf %82, %84 : vector<16x256xf32>
    %86 = vector.extract_strided_slice %85 {offsets = [0, 0], sizes = [16, 64], strides = [1, 1]} : vector<16x256xf32> to vector<16x64xf32>
    %87 = vector.extract_strided_slice %85 {offsets = [0, 64], sizes = [16, 64], strides = [1, 1]} : vector<16x256xf32> to vector<16x64xf32>
    %88 = vector.extract_strided_slice %85 {offsets = [0, 128], sizes = [16, 64], strides = [1, 1]} : vector<16x256xf32> to vector<16x64xf32>
    %89 = vector.extract_strided_slice %86 {offsets = [0, 0], sizes = [16, 16], strides = [1, 1]} : vector<16x64xf32> to vector<16x16xf32>
    %90 = vector.extract_strided_slice %87 {offsets = [0, 0], sizes = [16, 16], strides = [1, 1]} : vector<16x64xf32> to vector<16x16xf32>
    %91 = vector.extract_strided_slice %88 {offsets = [0, 0], sizes = [16, 16], strides = [1, 1]} : vector<16x64xf32> to vector<16x16xf32>
    "tpu.trace_start"() <{level = 10 : i32, message = "qd,kd->qk"}> : () -> ()
    %cst_47 = arith.constant dense<0.000000e+00> : vector<16x16xf32>
    %92 = tpu.matmul %89, %90, %cst_47 {dimension_numbers = #tpu.dot_dimension_numbers<[1], [1], [0], [0], [0, 0, 1, 0], [], []>} : vector<16x16xf32>, vector<16x16xf32>, vector<16x16xf32> -> vector<16x16xf32>
    "tpu.trace_stop"() : () -> ()
    %93 = arith.addf %92, %1 : vector<16x16xf32>
    %cst_48 = arith.constant dense<0xFF800000> : vector<16xf32>
    %94 = vector.multi_reduction <maximumf>, %93, %cst_48 [1] : vector<16x16xf32> to vector<16xf32>
    %95 = vector.shape_cast %94 : vector<16xf32> to vector<16x1xf32>
    %96 = vector.broadcast %95 : vector<16x1xf32> to vector<16x16xf32>
    %97 = arith.subf %93, %96 : vector<16x16xf32>
    %98 = math.exp %97 : vector<16x16xf32>
    %cst_49 = arith.constant dense<0.000000e+00> : vector<16xf32>
    %99 = vector.multi_reduction <add>, %98, %cst_49 [1] : vector<16x16xf32> to vector<16xf32>
    %100 = vector.shape_cast %99 : vector<16xf32> to vector<16x1xf32>
    %101 = tpu.reciprocal %100 {approx = true} : vector<16x1xf32> -> vector<16x1xf32>
    %102 = vector.broadcast %101 : vector<16x1xf32> to vector<16x16xf32>
    %103 = arith.mulf %98, %102 : vector<16x16xf32>
    %cst_50 = arith.constant dense<0.000000e+00> : vector<16x16xf32>
    %104 = tpu.matmul %103, %91, %cst_50 {dimension_numbers = #tpu.dot_dimension_numbers<[1], [0], [0], [1], [0, 0, 1, 1], [], []>} : vector<16x16xf32>, vector<16x16xf32>, vector<16x16xf32> -> vector<16x16xf32>
    %105 = vector.extract_strided_slice %86 {offsets = [0, 16], sizes = [16, 16], strides = [1, 1]} : vector<16x64xf32> to vector<16x16xf32>
    %106 = vector.extract_strided_slice %87 {offsets = [0, 16], sizes = [16, 16], strides = [1, 1]} : vector<16x64xf32> to vector<16x16xf32>
    %107 = vector.extract_strided_slice %88 {offsets = [0, 16], sizes = [16, 16], strides = [1, 1]} : vector<16x64xf32> to vector<16x16xf32>
    "tpu.trace_start"() <{level = 10 : i32, message = "qd,kd->qk"}> : () -> ()
    %cst_51 = arith.constant dense<0.000000e+00> : vector<16x16xf32>
    %108 = tpu.matmul %105, %106, %cst_51 {dimension_numbers = #tpu.dot_dimension_numbers<[1], [1], [0], [0], [0, 0, 1, 0], [], []>} : vector<16x16xf32>, vector<16x16xf32>, vector<16x16xf32> -> vector<16x16xf32>
    "tpu.trace_stop"() : () -> ()
    %109 = arith.addf %108, %1 : vector<16x16xf32>
    %cst_52 = arith.constant dense<0xFF800000> : vector<16xf32>
    %110 = vector.multi_reduction <maximumf>, %109, %cst_52 [1] : vector<16x16xf32> to vector<16xf32>
    %111 = vector.shape_cast %110 : vector<16xf32> to vector<16x1xf32>
    %112 = vector.broadcast %111 : vector<16x1xf32> to vector<16x16xf32>
    %113 = arith.subf %109, %112 : vector<16x16xf32>
    %114 = math.exp %113 : vector<16x16xf32>
    %cst_53 = arith.constant dense<0.000000e+00> : vector<16xf32>
    %115 = vector.multi_reduction <add>, %114, %cst_53 [1] : vector<16x16xf32> to vector<16xf32>
    %116 = vector.shape_cast %115 : vector<16xf32> to vector<16x1xf32>
    %117 = tpu.reciprocal %116 {approx = true} : vector<16x1xf32> -> vector<16x1xf32>
    %118 = vector.broadcast %117 : vector<16x1xf32> to vector<16x16xf32>
    %119 = arith.mulf %114, %118 : vector<16x16xf32>
    %cst_54 = arith.constant dense<0.000000e+00> : vector<16x16xf32>
    %120 = tpu.matmul %119, %107, %cst_54 {dimension_numbers = #tpu.dot_dimension_numbers<[1], [0], [0], [1], [0, 0, 1, 1], [], []>} : vector<16x16xf32>, vector<16x16xf32>, vector<16x16xf32> -> vector<16x16xf32>
    %121 = vector.extract_strided_slice %86 {offsets = [0, 32], sizes = [16, 16], strides = [1, 1]} : vector<16x64xf32> to vector<16x16xf32>
    %122 = vector.extract_strided_slice %87 {offsets = [0, 32], sizes = [16, 16], strides = [1, 1]} : vector<16x64xf32> to vector<16x16xf32>
    %123 = vector.extract_strided_slice %88 {offsets = [0, 32], sizes = [16, 16], strides = [1, 1]} : vector<16x64xf32> to vector<16x16xf32>
    "tpu.trace_start"() <{level = 10 : i32, message = "qd,kd->qk"}> : () -> ()
    %cst_55 = arith.constant dense<0.000000e+00> : vector<16x16xf32>
    %124 = tpu.matmul %121, %122, %cst_55 {dimension_numbers = #tpu.dot_dimension_numbers<[1], [1], [0], [0], [0, 0, 1, 0], [], []>} : vector<16x16xf32>, vector<16x16xf32>, vector<16x16xf32> -> vector<16x16xf32>
    "tpu.trace_stop"() : () -> ()
    %125 = arith.addf %124, %1 : vector<16x16xf32>
    %cst_56 = arith.constant dense<0xFF800000> : vector<16xf32>
    %126 = vector.multi_reduction <maximumf>, %125, %cst_56 [1] : vector<16x16xf32> to vector<16xf32>
    %127 = vector.shape_cast %126 : vector<16xf32> to vector<16x1xf32>
    %128 = vector.broadcast %127 : vector<16x1xf32> to vector<16x16xf32>
    %129 = arith.subf %125, %128 : vector<16x16xf32>
    %130 = math.exp %129 : vector<16x16xf32>
    %cst_57 = arith.constant dense<0.000000e+00> : vector<16xf32>
    %131 = vector.multi_reduction <add>, %130, %cst_57 [1] : vector<16x16xf32> to vector<16xf32>
    %132 = vector.shape_cast %131 : vector<16xf32> to vector<16x1xf32>
    %133 = tpu.reciprocal %132 {approx = true} : vector<16x1xf32> -> vector<16x1xf32>
    %134 = vector.broadcast %133 : vector<16x1xf32> to vector<16x16xf32>
    %135 = arith.mulf %130, %134 : vector<16x16xf32>
    %cst_58 = arith.constant dense<0.000000e+00> : vector<16x16xf32>
    %136 = tpu.matmul %135, %123, %cst_58 {dimension_numbers = #tpu.dot_dimension_numbers<[1], [0], [0], [1], [0, 0, 1, 1], [], []>} : vector<16x16xf32>, vector<16x16xf32>, vector<16x16xf32> -> vector<16x16xf32>
    %137 = vector.extract_strided_slice %86 {offsets = [0, 48], sizes = [16, 16], strides = [1, 1]} : vector<16x64xf32> to vector<16x16xf32>
    %138 = vector.extract_strided_slice %87 {offsets = [0, 48], sizes = [16, 16], strides = [1, 1]} : vector<16x64xf32> to vector<16x16xf32>
    %139 = vector.extract_strided_slice %88 {offsets = [0, 48], sizes = [16, 16], strides = [1, 1]} : vector<16x64xf32> to vector<16x16xf32>
    "tpu.trace_start"() <{level = 10 : i32, message = "qd,kd->qk"}> : () -> ()
    %cst_59 = arith.constant dense<0.000000e+00> : vector<16x16xf32>
    %140 = tpu.matmul %137, %138, %cst_59 {dimension_numbers = #tpu.dot_dimension_numbers<[1], [1], [0], [0], [0, 0, 1, 0], [], []>} : vector<16x16xf32>, vector<16x16xf32>, vector<16x16xf32> -> vector<16x16xf32>
    "tpu.trace_stop"() : () -> ()
    %141 = arith.addf %140, %1 : vector<16x16xf32>
    %cst_60 = arith.constant dense<0xFF800000> : vector<16xf32>
    %142 = vector.multi_reduction <maximumf>, %141, %cst_60 [1] : vector<16x16xf32> to vector<16xf32>
    %143 = vector.shape_cast %142 : vector<16xf32> to vector<16x1xf32>
    %144 = vector.broadcast %143 : vector<16x1xf32> to vector<16x16xf32>
    %145 = arith.subf %141, %144 : vector<16x16xf32>
    %146 = math.exp %145 : vector<16x16xf32>
    %cst_61 = arith.constant dense<0.000000e+00> : vector<16xf32>
    %147 = vector.multi_reduction <add>, %146, %cst_61 [1] : vector<16x16xf32> to vector<16xf32>
    %148 = vector.shape_cast %147 : vector<16xf32> to vector<16x1xf32>
    %149 = tpu.reciprocal %148 {approx = true} : vector<16x1xf32> -> vector<16x1xf32>
    %150 = vector.broadcast %149 : vector<16x1xf32> to vector<16x16xf32>
    %151 = arith.mulf %146, %150 : vector<16x16xf32>
    %cst_62 = arith.constant dense<0.000000e+00> : vector<16x16xf32>
    %152 = tpu.matmul %151, %139, %cst_62 {dimension_numbers = #tpu.dot_dimension_numbers<[1], [0], [0], [1], [0, 0, 1, 1], [], []>} : vector<16x16xf32>, vector<16x16xf32>, vector<16x16xf32> -> vector<16x16xf32>
    %153 = tpu.concatenate %104, %120, %136, %152 in 1 : vector<16x16xf32>, vector<16x16xf32>, vector<16x16xf32>, vector<16x16xf32> -> vector<16x64xf32>
    %cst_63 = arith.constant dense<0.000000e+00> : vector<16x64xf32>
    %154 = tpu.matmul %153, %41, %cst_63 {dimension_numbers = #tpu.dot_dimension_numbers<[1], [0], [0], [1], [0, 0, 1, 1], [], []>} : vector<16x64xf32>, vector<64x64xf32>, vector<16x64xf32> -> vector<16x64xf32>
    %155 = vector.broadcast %75 : vector<1x64xf32> to vector<16x64xf32>
    %156 = arith.addf %154, %155 : vector<16x64xf32>
    %157 = arith.addf %156, %0 : vector<16x64xf32>
    %cst_64 = arith.constant dense<0.000000e+00> : vector<16xf32>
    %158 = vector.multi_reduction <add>, %157, %cst_64 [1] : vector<16x64xf32> to vector<16xf32>
    %159 = vector.shape_cast %158 : vector<16xf32> to vector<16x1xf32>
    %cst_65 = arith.constant 6.400000e+01 : f32
    %160 = vector.broadcast %cst_65 : f32 to vector<16x1xf32>
    %161 = arith.divf %159, %160 : vector<16x1xf32>
    %162 = vector.broadcast %161 : vector<16x1xf32> to vector<16x64xf32>
    %163 = arith.subf %157, %162 : vector<16x64xf32>
    %164 = arith.mulf %163, %163 : vector<16x64xf32>
    %cst_66 = arith.constant dense<0.000000e+00> : vector<16xf32>
    %165 = vector.multi_reduction <add>, %164, %cst_66 [1] : vector<16x64xf32> to vector<16xf32>
    %166 = vector.shape_cast %165 : vector<16xf32> to vector<16x1xf32>
    %cst_67 = arith.constant 6.400000e+01 : f32
    %167 = vector.broadcast %cst_67 : f32 to vector<16x1xf32>
    %168 = arith.divf %166, %167 : vector<16x1xf32>
    %cst_68 = arith.constant 9.99999996E-13 : f32
    %169 = vector.broadcast %cst_68 : f32 to vector<16x1xf32>
    %170 = arith.addf %168, %169 : vector<16x1xf32>
    %171 = math.rsqrt %170 : vector<16x1xf32>
    %172 = vector.broadcast %171 : vector<16x1xf32> to vector<16x64xf32>
    %173 = arith.mulf %163, %172 : vector<16x64xf32>
    %174 = vector.broadcast %78 : vector<1x64xf32> to vector<16x64xf32>
    %175 = arith.mulf %173, %174 : vector<16x64xf32>
    %176 = vector.broadcast %79 : vector<1x64xf32> to vector<16x64xf32>
    %177 = arith.addf %175, %176 : vector<16x64xf32>
    %cst_69 = arith.constant dense<0.000000e+00> : vector<16x128xf32>
    %178 = tpu.matmul %177, %52, %cst_69 {dimension_numbers = #tpu.dot_dimension_numbers<[1], [0], [0], [1], [0, 0, 1, 1], [], []>} : vector<16x64xf32>, vector<64x128xf32>, vector<16x128xf32> -> vector<16x128xf32>
    %179 = vector.broadcast %76 : vector<1x128xf32> to vector<16x128xf32>
    %180 = arith.addf %178, %179 : vector<16x128xf32>
    %cst_70 = arith.constant 5.000000e-01 : f32
    %181 = vector.broadcast %cst_70 : f32 to vector<16x128xf32>
    %182 = arith.mulf %180, %181 : vector<16x128xf32>
    %cst_71 = arith.constant 0.707106769 : f32
    %183 = vector.broadcast %cst_71 : f32 to vector<16x128xf32>
    %184 = arith.mulf %180, %183 : vector<16x128xf32>
    %185 = math.erf %184 : vector<16x128xf32>
    %cst_72 = arith.constant 1.000000e+00 : f32
    %186 = vector.broadcast %cst_72 : f32 to vector<16x128xf32>
    %187 = arith.addf %186, %185 : vector<16x128xf32>
    %188 = arith.mulf %182, %187 : vector<16x128xf32>
    %cst_73 = arith.constant dense<0.000000e+00> : vector<16x64xf32>
    %189 = tpu.matmul %188, %63, %cst_73 {dimension_numbers = #tpu.dot_dimension_numbers<[1], [0], [0], [1], [0, 0, 1, 1], [], []>} : vector<16x128xf32>, vector<128x64xf32>, vector<16x64xf32> -> vector<16x64xf32>
    %190 = vector.broadcast %77 : vector<1x64xf32> to vector<16x64xf32>
    %191 = arith.addf %189, %190 : vector<16x64xf32>
    %192 = arith.addf %191, %177 : vector<16x64xf32>
    %cst_74 = arith.constant dense<0.000000e+00> : vector<16xf32>
    %193 = vector.multi_reduction <add>, %192, %cst_74 [1] : vector<16x64xf32> to vector<16xf32>
    %194 = vector.shape_cast %193 : vector<16xf32> to vector<16x1xf32>
    %cst_75 = arith.constant 6.400000e+01 : f32
    %195 = vector.broadcast %cst_75 : f32 to vector<16x1xf32>
    %196 = arith.divf %194, %195 : vector<16x1xf32>
    %197 = vector.broadcast %196 : vector<16x1xf32> to vector<16x64xf32>
    %198 = arith.subf %192, %197 : vector<16x64xf32>
    %199 = arith.mulf %198, %198 : vector<16x64xf32>
    %cst_76 = arith.constant dense<0.000000e+00> : vector<16xf32>
    %200 = vector.multi_reduction <add>, %199, %cst_76 [1] : vector<16x64xf32> to vector<16xf32>
    %201 = vector.shape_cast %200 : vector<16xf32> to vector<16x1xf32>
    %cst_77 = arith.constant 6.400000e+01 : f32
    %202 = vector.broadcast %cst_77 : f32 to vector<16x1xf32>
    %203 = arith.divf %201, %202 : vector<16x1xf32>
    %cst_78 = arith.constant 9.99999996E-13 : f32
    %204 = vector.broadcast %cst_78 : f32 to vector<16x1xf32>
    %205 = arith.addf %203, %204 : vector<16x1xf32>
    %206 = math.rsqrt %205 : vector<16x1xf32>
    %207 = vector.broadcast %206 : vector<16x1xf32> to vector<16x64xf32>
    %208 = arith.mulf %198, %207 : vector<16x64xf32>
    %209 = vector.broadcast %80 : vector<1x64xf32> to vector<16x64xf32>
    %210 = arith.mulf %208, %209 : vector<16x64xf32>
    %211 = vector.broadcast %81 : vector<1x64xf32> to vector<16x64xf32>
    %212 = arith.addf %210, %211 : vector<16x64xf32>
    %c0_79 = arith.constant 0 : index
    %c0_80 = arith.constant 0 : index
    %213 = vector.load %arg11[%c0_79, %c0_80] : memref<16x64xf32, #tpu.memory_space<vmem>>, vector<16x64xf32>
    tpu.vector_store %arg11[%c0_79, %c0_80], %212 {strides = array<i32>} : memref<16x64xf32, #tpu.memory_space<vmem>>, vector<16x64xf32>,
    return
  }
  func.func @transform_0(%arg0: i32) -> (i32, i32) {
    %c0_i32 = arith.constant 0 : i32
    %c0_i32_0 = arith.constant 0 : i32
    %c0_i32_1 = arith.constant 0 : i32
    return %c0_i32, %c0_i32_0 : i32, i32
  }
  func.func @transform_1(%arg0: i32) -> (i32, i32) {
    %c0_i32 = arith.constant 0 : i32
    %c0_i32_0 = arith.constant 0 : i32
    %c0_i32_1 = arith.constant 0 : i32
    return %c0_i32, %c0_i32_0 : i32, i32
  }
  func.func @transform_2(%arg0: i32) -> (i32, i32) {
    %c0_i32 = arith.constant 0 : i32
    %c0_i32_0 = arith.constant 0 : i32
    %c0_i32_1 = arith.constant 0 : i32
    return %c0_i32, %c0_i32_0 : i32, i32
  }
  func.func @transform_3(%arg0: i32) -> (i32, i32) {
    %c0_i32 = arith.constant 0 : i32
    %c0_i32_0 = arith.constant 0 : i32
    %c0_i32_1 = arith.constant 0 : i32
    return %c0_i32, %c0_i32_0 : i32, i32
  }
  func.func @transform_4(%arg0: i32) -> (i32, i32) {
    %c0_i32 = arith.constant 0 : i32
    %c0_i32_0 = arith.constant 0 : i32
    %c0_i32_1 = arith.constant 0 : i32
    return %c0_i32, %c0_i32_0 : i32, i32
  }
  func.func @transform_5(%arg0: i32) -> (i32, i32, i32) {
    %c0_i32 = arith.constant 0 : i32
    %c0_i32_0 = arith.constant 0 : i32
    %c0_i32_1 = arith.constant 0 : i32
    %c0_i32_2 = arith.constant 0 : i32
    return %c0_i32, %c0_i32_0, %c0_i32_1 : i32, i32, i32
  }
  func.func @transform_6(%arg0: i32) -> (i32, i32, i32) {
    %c0_i32 = arith.constant 0 : i32
    %c0_i32_0 = arith.constant 0 : i32
    %c0_i32_1 = arith.constant 0 : i32
    %c0_i32_2 = arith.constant 0 : i32
    return %c0_i32, %c0_i32_0, %c0_i32_1 : i32, i32, i32
  }
  func.func @transform_7(%arg0: i32) -> (i32, i32, i32) {
    %c0_i32 = arith.constant 0 : i32
    %c0_i32_0 = arith.constant 0 : i32
    %c0_i32_1 = arith.constant 0 : i32
    %c0_i32_2 = arith.constant 0 : i32
    return %c0_i32, %c0_i32_0, %c0_i32_1 : i32, i32, i32
  }
  func.func @transform_8(%arg0: i32) -> (i32, i32, i32) {
    %c0_i32 = arith.constant 0 : i32
    %c0_i32_0 = arith.constant 0 : i32
    %c0_i32_1 = arith.constant 0 : i32
    %c0_i32_2 = arith.constant 0 : i32
    return %c0_i32, %c0_i32_0, %c0_i32_1 : i32, i32, i32
  }
  func.func @transform_9(%arg0: i32) -> (i32, i32, i32) {
    %c0_i32 = arith.constant 0 : i32
    %c0_i32_0 = arith.constant 0 : i32
    %c0_i32_1 = arith.constant 0 : i32
    %c0_i32_2 = arith.constant 0 : i32
    return %c0_i32, %c0_i32_0, %c0_i32_1 : i32, i32, i32
  }
  func.func @transform_10(%arg0: i32) -> (i32, i32) {
    %c0_i32 = arith.constant 0 : i32
    %c0_i32_0 = arith.constant 0 : i32
    %c0_i32_1 = arith.constant 0 : i32
    return %c0_i32, %c0_i32_0 : i32, i32
  }
}

</mosaic_0001>

<bundles_post_ra>
// kernel: bert_moe_forward.1
= control target key start
LH: loop header
LB: loop body
LE: loop exit
PB: predicated region body
PF: predicated region fallthrough
CT: control target
= control target key end

     0   :  { %15 = vsyncpa [#allocation3], 0  ;;  %s3291_s0 = inlined_call_operand.hbm [shape: f32[16,64], index: 0, kind: input, shape index: {}]   ;;  %s3292_s1 = inlined_call_operand.vmem [shape: f32[16,16], index: 1, kind: input, shape index: {}]   ;;  %s3293_s2 = inlined_call_operand.vmem [shape: f32[64,512], index: 2, kind: input, shape index: {}]   ;;  %s3294_s3 = inlined_call_operand.hbm [shape: f32[1,512], index: 3, kind: input, shape index: {}]   ;;  %s3295_s4 = inlined_call_operand.vmem [shape: f32[2,512], index: 4, kind: input, shape index: {}]   ;;  %s3296_s5 = inlined_call_operand.hbm [shape: f32[2,64,256], index: 5, kind: input, shape index: {}]   ;;  %s3297_s6 = inlined_call_operand.vmem [shape: f32[2,64,64], index: 6, kind: input, shape index: {}]   ;;  %s3298_s7 = inlined_call_operand.hbm [shape: f32[2,64,128], index: 7, kind: input, shape index: {}]   ;;  %s3299_s8 = inlined_call_operand.vmem [shape: f32[2,128,64], index: 8, kind: input, shape index: {}]   ;;  %s3300_s9 = inlined_call_operand.vmem [shape: f32[2,8,256], index: 9, kind: input, shape index: {}]   ;;  %s3301_s10 = inlined_call_operand.hbm [shape: f32[16,64], index: 10, kind: output, shape index: {}]  }
   0x1   :  { %16 = vsyncpa [#allocation6], 0 }
   0x2   :  { %17 = vsyncpa [#allocation9], 0 }
   0x3   :  { %18 = vsyncpa [#allocation4], 0  ;;  %s2510_s13 = smov [#allocation5]   ;;  %s2511_s15 = smov [#allocation2]  }
   0x4   :  { %s41_s14 = sshll.u32 %s2510_s13, 4  ;;  %s24_s16 = sshll.u32 %s2511_s15, 4  ;;  %s42_s14 = int_to_ptr.vmem [resolvable:$true] %s41_s14  ;;  %s2581_s16 = int_to_ptr.vmem [resolvable:$true] %s24_s16 }
   0x5   :  { %s2392_s19 = scalar_lea.hbm %s3294_s3, 64 }
   0x6   :  { %p2393_p0 = scmp.ne.s32.totalorder %s3294_s3, %s2392_s19  ;;  %p2396_p1 = scmp.lt.u32.totalorder %s2392_s19, %s3294_s3 }
   0x8   :  { %p2398_p2 = pnand %p2396_p1, %p2393_p0 }
   0xa   :  { %2401 = shalt.err (!%p2398_p2)
}
   0xb   :  { %s2402_s24 = scalar_lea.vmem %s42_s14, 64  ;;  %p2407_p4 = scmp.lt.s32.totalorder %s42_s14, %s42_s14 }
   0xc   :  { %p2403_p3 = scmp.ne.s32.totalorder %s42_s14, %s2402_s24  ;;  %p2408_p5 = scmp.lt.s32.totalorder %s2402_s24, %s2402_s24 }
   0xe   :  { %p2409_p6 = por %p2408_p5, %p2407_p4 }
  0x10   :  { %p2410_p7 = pnand %p2409_p6, %p2403_p3 }
  0x12   :  { %2413 = shalt.err (!%p2410_p7)
}
  0x13   :  { %44 = dma.hbm_to_vmem [thread:$0]  %s3294_s3, 64, %s42_s14, [#allocation6]  }
  0x14   :  { %s2414_s29 = scalar_lea.hbm %s3291_s0, 256 }
  0x15   :  { %p2415_p8 = scmp.ne.s32.totalorder %s3291_s0, %s2414_s29  ;;  %p2418_p9 = scmp.lt.u32.totalorder %s2414_s29, %s3291_s0 }
  0x17   :  { %p2420_p10 = pnand %p2418_p9, %p2415_p8 }
  0x19   :  { %2423 = shalt.err (!%p2420_p10)
}
  0x1a   :  { %s2424_s15 = scalar_lea.vmem %s2581_s16, 256  ;;  %p2429_p12 = scmp.lt.s32.totalorder %s2581_s16, %s2581_s16 }
  0x1b   :  { %p2425_p11 = scmp.ne.s32.totalorder %s2581_s16, %s2424_s15  ;;  %p2430_p13 = scmp.lt.s32.totalorder %s2424_s15, %s2424_s15 }
  0x1d   :  { %p2431_p0 = por %p2430_p13, %p2429_p12 }
  0x1f   :  { %p2432_p1 = pnand %p2431_p0, %p2425_p11 }
  0x21   :  { %2435 = shalt.err (!%p2432_p1)
}
  0x22   :  { %s2512_s3 = smov 128   ;;  %s2513_s14 = smov 8  }
  0x23   :  { %30 = dma.hbm_to_vmem [thread:$0]  %s3291_s0, 256, %s2581_s16, [#allocation3], %s2512_s3, %s2512_s3, %s2513_s14  }
  0x24   :  { %s2514_s19 = smov [#allocation7]   ;;  %s2436_s23 = scalar_lea.hbm %s3296_s5, 4096 }
  0x25   :  { %s52_s20 = sshll.u32 %s2514_s19, 4  ;;  %p2437_p2 = scmp.ne.s32.totalorder %s3296_s5, %s2436_s23  ;;  %s53_s20 = int_to_ptr.vmem [resolvable:$true] %s52_s20 }
  0x26   :  { %p2440_p3 = scmp.lt.u32.totalorder %s2436_s23, %s3296_s5 }
  0x28   :  { %p2442_p4 = pnand %p2440_p3, %p2437_p2 }
  0x2a   :  { %2445 = shalt.err (!%p2442_p4)
}
  0x2b   :  { %s2446_s28 = scalar_lea.vmem %s53_s20, 4096  ;;  %p2451_p6 = scmp.lt.s32.totalorder %s53_s20, %s53_s20 }
  0x2c   :  { %p2447_p5 = scmp.ne.s32.totalorder %s53_s20, %s2446_s28  ;;  %p2452_p7 = scmp.lt.s32.totalorder %s2446_s28, %s2446_s28 }
  0x2e   :  { %p2453_p8 = por %p2452_p7, %p2451_p6 }
  0x30   :  { %p2454_p9 = pnand %p2453_p8, %p2447_p5 }
  0x32   :  { %2457 = shalt.err (!%p2454_p9)
}
  0x33   :  { %s2515_s0 = smov 256   ;;  %s2516_s16 = smov 16  }
  0x34   :  { %58 = dma.hbm_to_vmem [thread:$0]  %s3296_s5, 4096, %s53_s20, [#allocation6], %s2515_s0, %s2515_s0, %s2516_s16  }
  0x35   :  { %s2517_s11 = smov [#allocation8]   ;;  %s2458_s17 = scalar_lea.hbm %s3298_s7, 2048 }
  0x36   :  { %s66_s12 = sshll.u32 %s2517_s11, 4  ;;  %p2459_p10 = scmp.ne.s32.totalorder %s3298_s7, %s2458_s17  ;;  %s67_s12 = int_to_ptr.vmem [resolvable:$true] %s66_s12 }
  0x37   :  { %p2462_p11 = scmp.lt.u32.totalorder %s2458_s17, %s3298_s7 }
  0x39   :  { %p2464_p12 = pnand %p2462_p11, %p2459_p10 }
  0x3b   :  { %2467 = shalt.err (!%p2464_p12)
}
  0x3c   :  { %s2468_s23 = scalar_lea.vmem %s67_s12, 2048  ;;  %p2473_p0 = scmp.lt.s32.totalorder %s67_s12, %s67_s12 }
  0x3d   :  { %p2469_p13 = scmp.ne.s32.totalorder %s67_s12, %s2468_s23  ;;  %p2474_p1 = scmp.lt.s32.totalorder %s2468_s23, %s2468_s23 }
  0x3f   :  { %p2475_p2 = por %p2474_p1, %p2473_p0 }
  0x41   :  { %p2476_p3 = pnand %p2475_p2, %p2469_p13 }
  0x43   :  { %2479 = shalt.err (!%p2476_p3)
}
  0x44   :  { %72 = dma.hbm_to_vmem [thread:$0]  %s3298_s7, 2048, %s67_s12, [#allocation9], %s2512_s3, %s2512_s3, %s2513_s14  }
  0x45   :  { %2502 = dma.done.wait [#allocation3], 256  }
  0x46   :  { %2503 = vsyncadd [#allocation3], 4294967040 }
  0x47   :  { %2504 = dma.done.wait [#allocation6], 4160  }
  0x48   :  { %2505 = vsyncadd [#allocation6], 4294963136 }
  0x49   :  { %2506 = dma.done.wait [#allocation9], 2048  }
  0x4a   :  { %2507 = vsyncadd [#allocation9], 4294965248  ;;  %v2518_v0 = vmov 0.0   ;;  %v95_v1 = vld [vmem:[%s3293_s2 + $0x8] sm:$0xff]  ;;  %v94_v3 = vld [vmem:[%s3293_s2] sm:$0xff]  ;;  %vm147_vm0 = vcmask 523264   ;;  %v127_v50 = vlaneseq }
  0x4b   :  { %215 = vmatprep.mubr.f32.mxu0 %v2518_v0  ;;  %v99_v2 = vld [vmem:[%s3293_s2 + $0x28] sm:$0xff]  ;;  %v98_v5 = vld [vmem:[%s3293_s2 + $0x20] sm:$0xff]  ;;  %v97_v24 = vld [vmem:[%s3293_s2 + $0x18] sm:$0xff]  ;;  %vm323_vm1 = vcmask 1040384   ;;  %vm700_vm3 = vcmask 130048   ;;  %s2520_s30 = smov 112  }
  0x4c   :  { %v2140_v4 = vpack.c.bf16 %v99_v2, %v95_v1  ;;  %v103_v6 = vld [vmem:[%s3293_s2 + $0x48] sm:$0xff]  ;;  %v2142_v8 = vpack.c.bf16 %v98_v5, %v94_v3  ;;  %v102_v10 = vld [vmem:[%s3293_s2 + $0x40] sm:$0xff]  ;;  %v101_v25 = vld [vmem:[%s3293_s2 + $0x38] sm:$0xff]  ;;  %v2748_v51 = vshrl.u32 %v127_v50, 7  ;;  %s2521_s11 = smov 32   ;;  %s2522_s12 = smov 96  }
  0x4d   :  { %v107_v7 = vld [vmem:[%s3293_s2 + $0x68] sm:$0xff]  ;;  %v106_v11 = vld [vmem:[%s3293_s2 + $0x60] sm:$0xff]  ;;  %v2156_v27 = vpack.c.bf16 %v101_v25, %v97_v24  ;;  %v96_v28 = vld [vmem:[%s3293_s2 + $0x10] sm:$0xff]  ;;  %s2523_s18 = smov 48   ;;  %vm1515_vm5 = vcmask 261120   ;;  %vm1518_vm6 = vcmask 392192  }
  0x4e   :  { %v2144_v9 = vpack.c.bf16 %v107_v7, %v103_v6  ;;  %v111_v12 = vld [vmem:[%s3293_s2 + $0x88] sm:$0xff]  ;;  %2141 = vmatprep.subr.bf16.mxu0 %v2140_v4  ;;  %v2146_v14 = vpack.c.bf16 %v106_v11, %v102_v10  ;;  %v110_v16 = vld [vmem:[%s3293_s2 + $0x80] sm:$0xff]  ;;  %v100_v29 = vld [vmem:[%s3293_s2 + $0x30] sm:$0xff]  ;;  %v2751_v52 = vsub.s32 0, %v2748_v51  ;;  %v2757_v54 = vsub.s32 2, %v2748_v51 }
  0x4f   :  { %v115_v13 = vld [vmem:[%s3293_s2 + $0xa8] sm:$0xff]  ;;  %2143 = vmatpush1.bf16.msra.mxu0 %v2142_v8  ;;  %v114_v17 = vld [vmem:[%s3293_s2 + $0xa0] sm:$0xff]  ;;  %v105_v30 = vld [vmem:[%s3293_s2 + $0x58] sm:$0xff]  ;;  %v2158_v33 = vpack.c.bf16 %v100_v29, %v96_v28  ;;  %v2762_v58 = vsub.s32 1, %v2748_v51  ;;  %v137_v8 = vsub.s32 4, %v2748_v51  ;;  %v141_v10 = vsub.s32 6, %v2748_v51 }
  0x50   :  { %2145 = vmatprep.subr.bf16.mxu0 %v2144_v9  ;;  %v2148_v15 = vpack.c.bf16 %v115_v13, %v111_v12  ;;  %v119_v18 = vld [vmem:[%s3293_s2 + $0xc8] sm:$0xff]  ;;  %v2150_v20 = vpack.c.bf16 %v114_v17, %v110_v16  ;;  %v118_v22 = vld [vmem:[%s3293_s2 + $0xc0] sm:$0xff]  ;;  %v109_v31 = vld [vmem:[%s3293_s2 + $0x78] sm:$0xff]  ;;  %v313_v13 = vsub.s32 3, %v2748_v51 }
  0x51   :  { %v123_v19 = vld [vmem:[%s3293_s2 + $0xe8] sm:$0xff]  ;;  %v122_v23 = vld [vmem:[%s3293_s2 + $0xe0] sm:$0xff]  ;;  %v2160_v34 = vpack.c.bf16 %v109_v31, %v105_v30  ;;  %v104_v35 = vld [vmem:[%s3293_s2 + $0x50] sm:$0xff] }
  0x52   :  { %v2152_v21 = vpack.c.bf16 %v123_v19, %v119_v18  ;;  %v2154_v26 = vpack.c.bf16 %v122_v23, %v118_v22  ;;  %v2710_v32 = vld [vmem:[#allocation2] sm:$0xff]  ;;  %v108_v36 = vld [vmem:[%s3293_s2 + $0x70] sm:$0xff]  ;;  %v113_v37 = vld [vmem:[%s3293_s2 + $0x98] sm:$0xff] }
  0x53   :  { %2147 = vmatpush1.bf16.msra.mxu0 %v2146_v14  ;;  %v117_v38 = vld [vmem:[%s3293_s2 + $0xb8] sm:$0xff]  ;;  %v2162_v39 = vpack.c.bf16 %v108_v36, %v104_v35  ;;  %v112_v41 = vld [vmem:[%s3293_s2 + $0x90] sm:$0xff]  ;;  %v93_v53 = vld [vmem:[%s3295_s4] sm:$0xff] }
  0x54   :  { %2149 = vmatprep.subr.bf16.mxu0 %v2148_v15  ;;  %v2164_v40 = vpack.c.bf16 %v117_v38, %v113_v37  ;;  %v116_v42 = vld [vmem:[%s3293_s2 + $0xb0] sm:$0xff]  ;;  %v121_v43 = vld [vmem:[%s3293_s2 + $0xd8] sm:$0xff]  ;;  %v130_v55 = vrot.slane %v93_v53, %v2751_v52  ;;  %v134_v57 = vrot.slane %v93_v53, %v2757_v54  ;;  %v138_v11 = vrot.slane %v93_v53, %v137_v8  ;;  %v600_v35 = vld [vmem:[%s3300_s9] sm:$0xff] }
  0x55   :  { %v125_v44 = vld [vmem:[%s3293_s2 + $0xf8] sm:$0xff]  ;;  %v2166_v45 = vpack.c.bf16 %v116_v42, %v112_v41  ;;  %v120_v47 = vld [vmem:[%s3293_s2 + $0xd0] sm:$0xff]  ;;  %v142_v12 = vrot.slane %v93_v53, %v141_v10  ;;  %v336_v28 = vrot.slane %v93_v53, %v2762_v58  ;;  %vm3110_vm4 = vmpackc.low %vm700_vm3, %vm700_vm3 }
  0x56   :  { %v2168_v46 = vpack.c.bf16 %v125_v44, %v121_v43  ;;  %v124_v48 = vld [vmem:[%s3293_s2 + $0xf0] sm:$0xff]  ;;  %v344_v36 = vld [vmem:[#allocation7 + $0x88] sm:$0xff] }
  0x57   :  { %2151 = vmatpush1.bf16.msra.mxu0 %v2150_v20  ;;  %v2170_v49 = vpack.c.bf16 %v124_v48, %v120_v47  ;;  %v297_v56 = vld [vmem:[#allocation5] sm:$0xf]  ;;  %v343_v38 = vld [vmem:[#allocation7 + $0x80] sm:$0xff]  ;;  %v381_v43 = vld [vmem:[#allocation7 + $0x8] sm:$0xff] }
  0x58   :  { %2153 = vmatprep.subr.bf16.mxu0 %v2152_v21  ;;  %v302_v61 = vrot.slane %v297_v56, %v2751_v52  ;;  %v306_v1 = vrot.slane %v297_v56, %v2762_v58  ;;  %v310_v16 = vrot.slane %v297_v56, %v2757_v54  ;;  %v314_v19 = vrot.slane %v297_v56, %v313_v13  ;;  %v346_v37 = vld [vmem:[#allocation7 + $0x98] sm:$0xff]  ;;  %v385_v50 = vld [vmem:[#allocation7 + $0x28] sm:$0xff] }
  0x59   :  { %v350_v41 = vld [vmem:[#allocation7 + $0xb8] sm:$0xff] }
  0x5a   :  { %v383_v44 = vld [vmem:[#allocation7 + $0x18] sm:$0xff] }
  0x5b   :  { %2155 = vmatpush1.bf16.msra.mxu0 %v2154_v26  ;;  %v387_v53 = vld [vmem:[#allocation7 + $0x38] sm:$0xff] }
  0x5c   :  { %2157 = vmatprep.subr.bf16.mxu0 %v2156_v27 }
  0x5e   :  { %1882 = vmatmul.mubr.msk.f32.vlgmr.msra.gmra.mrb[0].mxu0 %vm147_vm0, %v2710_v32 }
  0x5f   :  { %2159 = vmatpush1.bf16.msra.mxu0 %v2158_v33  ;;  %286 = vmatprep.mubr.f32.mxu0 %v2518_v0 }
  0x60   :  { %2161 = vmatprep.subr.bf16.mxu0 %v2160_v34  ;;  %v1909_v34 = vld [vmem:[%s3300_s9 + $0x10] sm:$0xff] }
  0x63   :  { %2163 = vmatpush1.bf16.msra.mxu0 %v2162_v39  ;;  %v345_v39 = vld [vmem:[#allocation7 + $0x90] sm:$0xff] }
  0x64   :  { %2165 = vmatprep.subr.bf16.mxu0 %v2164_v40  ;;  %v348_v40 = vld [vmem:[#allocation7 + $0xa8] sm:$0xff] }
  0x67   :  { %2167 = vmatpush1.bf16.msra.mxu0 %v2166_v45  ;;  %v380_v45 = vld [vmem:[#allocation7] sm:$0xff] }
  0x68   :  { %2169 = vmatprep.subr.bf16.mxu0 %v2168_v46 }
  0x6b   :  { %2171 = vmatpush1.bf16.msra.mxu0 %v2170_v49  ;;  %v382_v49 = vld [vmem:[#allocation7 + $0x10] sm:$0xff] }
  0x6e   :  { %1883 = vmatmul.mubr.msk.f32.vlgmr.msra.gmra.mrb[2].mxu0 %vm147_vm0, %v2710_v32 }
  0x6f   :  { %681 = vmatprep.mubr.f32.mxu0 %v2518_v0 }
 0x131   :  { %v217_v59 = vpop.f32.mrb[0].mxu0 }
 0x132   :  { %v218_v60 = vadd.f32 %v217_v59, %v130_v55  ;;  %v219_v62 = vpop.f32.mrb[1].mxu0 }
 0x133   :  { %v220_v63 = vadd.f32 %v219_v62, %v134_v57 }
 0x134   :  { %v293_v2 = vmax.f32 %v218_v60, 0.0 }
 0x135   :  { %v294_v3 = vmax.f32 %v220_v63, 0.0 }
 0x136   :  { %v319_v4 = vmul.f32 %v302_v61, %v293_v2 }
 0x137   :  { %v320_v5 = vmul.f32 %v306_v1, %v294_v3 }
 0x138   :  { %v324_v6 = vsel %vm323_vm1, %v319_v4, 0.0 }
 0x139   :  { %v325_v7 = vsel %vm323_vm1, %v320_v5, 0.0  ;;  %v347_v5 = vld [vmem:[#allocation7 + $0xa0] sm:$0xff] }
 0x13a   :  { %v326_v9 = vadd.f32 %v325_v7, %v324_v6  ;;  %v349_v6 = vld [vmem:[#allocation7 + $0xb0] sm:$0xff]  ;;  %v384_v7 = vld [vmem:[#allocation7 + $0x20] sm:$0xff] }
 0x141   :  { %v288_v14 = vpop.f32.mrb[2].mxu0 }
 0x142   :  { %v289_v15 = vadd.f32 %v288_v14, %v138_v11  ;;  %v290_v17 = vpop.f32.mrb[3].mxu0 }
 0x143   :  { %v291_v18 = vadd.f32 %v290_v17, %v142_v12 }
 0x144   :  { %v295_v20 = vmax.f32 %v289_v15, 0.0  ;;  %v386_v15 = vld [vmem:[#allocation7 + $0x30] sm:$0xff] }
 0x145   :  { %v296_v21 = vmax.f32 %v291_v18, 0.0 }
 0x146   :  { %v321_v22 = vmul.f32 %v310_v16, %v295_v20  ;;  %v352_v16 = vld [vmem:[#allocation7 + $0xc8] sm:$0xff]  ;;  %v354_v20 = vld [vmem:[#allocation7 + $0xd8] sm:$0xff] }
 0x147   :  { %v322_v23 = vmul.f32 %v314_v19, %v296_v21  ;;  %v389_v21 = vld [vmem:[#allocation7 + $0x48] sm:$0xff] }
 0x148   :  { %v327_v24 = vsel %vm323_vm1, %v321_v22, 0.0  ;;  %v391_v22 = vld [vmem:[#allocation7 + $0x58] sm:$0xff] }
 0x149   :  { %v328_v25 = vadd.f32 %v327_v24, %v326_v9  ;;  %v329_v26 = vsel %vm323_vm1, %v322_v23, 0.0 }
 0x14b   :  { %v330_v27 = vadd.f32 %v329_v26, %v328_v25 }
 0x14d   :  { %331 = vadd.xlane.f32.xlu0 %v330_v27  ;;  %v351_v27 = vld [vmem:[#allocation7 + $0xc0] sm:$0xff] }
 0x1da   :  { %v332_v29 = vpop.xlane.xlu0 %331 }
 0x1db   :  { %v338_v30 = vadd.f32 %v336_v28, %v332_v29  ;;  %v353_v28 = vld [vmem:[#allocation7 + $0xd0] sm:$0xff]  ;;  %v388_v29 = vld [vmem:[#allocation7 + $0x40] sm:$0xff] }
 0x1dd   :  { %vm339_vm2 = vcmp.gt.f32.partialorder %v338_v30, 0.0 }
 0x1de   :  { %v1884_v31 = vsel %vm339_vm2, 1.0, %v2518_v0 }
 0x1df   :  { %2292 = vpush %v1884_v31  ;;  %v379_v33 = vsub.f32 1.0, %v1884_v31 }
 0x1e1   :  { %2294 = vpush %v379_v33 }
 0x210   :  { %s2293_s0 = spop %2292 }
 0x211   :  { %v2788_v42 = vstv %s2293_s0 }
 0x212   :  { %v598_v46 = vmul.f32 %v1909_v34, %v2788_v42  ;;  %s2295_s7 = spop %2294  ;;  %v364_v47 = vmul.f32 %v2788_v42, %v344_v36  ;;  %v366_v48 = vmul.f32 %v2788_v42, %v346_v37  ;;  %v363_v56 = vmul.f32 %v2788_v42, %v343_v38  ;;  %v356_v36 = vld [vmem:[#allocation7 + $0xe8] sm:$0xff] }
 0x213   :  { %v2793_v55 = vstv %s2295_s7  ;;  %v365_v57 = vmul.f32 %v2788_v42, %v345_v39  ;;  %v368_v59 = vmul.f32 %v2788_v42, %v348_v40  ;;  %v370_v2 = vmul.f32 %v2788_v42, %v350_v41  ;;  %v358_v41 = vld [vmem:[#allocation7 + $0xf8] sm:$0xff] }
 0x214   :  { %v602_v60 = vmul.f32 %v600_v35, %v2793_v55  ;;  %v401_v61 = vmul.f32 %v2793_v55, %v381_v43  ;;  %v403_v62 = vmul.f32 %v2793_v55, %v383_v44  ;;  %v400_v63 = vmul.f32 %v2793_v55, %v380_v45  ;;  %v390_v35 = vld [vmem:[#allocation7 + $0x50] sm:$0xff]  ;;  %v393_v43 = vld [vmem:[#allocation7 + $0x68] sm:$0xff] }
 0x215   :  { %v402_v1 = vmul.f32 %v2793_v55, %v382_v49  ;;  %v405_v3 = vmul.f32 %v2793_v55, %v385_v50  ;;  %v407_v4 = vmul.f32 %v2793_v55, %v387_v53  ;;  %v367_v24 = vmul.f32 %v2788_v42, %v347_v5  ;;  %v355_v49 = vld [vmem:[#allocation7 + $0xe0] sm:$0xff] }
 0x216   :  { %v417_v9 = vadd.f32 %v401_v61, %v364_v47  ;;  %v419_v11 = vadd.f32 %v403_v62, %v366_v48  ;;  %v2806_v12 = vadd.f32 %v602_v60, %v598_v46  ;;  %v416_v14 = vadd.f32 %v400_v63, %v363_v56  ;;  %v395_v48 = vld [vmem:[#allocation7 + $0x78] sm:$0xff]  ;;  %v392_v60 = vld [vmem:[#allocation7 + $0x60] sm:$0xff]  ;;  %v394_v61 = vld [vmem:[#allocation7 + $0x70] sm:$0xff] }
 0x217   :  { %v418_v17 = vadd.f32 %v402_v1, %v365_v57  ;;  %v421_v18 = vadd.f32 %v405_v3, %v368_v59  ;;  %v423_v19 = vadd.f32 %v407_v4, %v370_v2  ;;  %v369_v25 = vmul.f32 %v2788_v42, %v349_v6  ;;  %v357_v59 = vld [vmem:[#allocation7 + $0xf0] sm:$0xff]  ;;  %v1910_v3 = vld [vmem:[%s3300_s9 + $0x18] sm:$0xff] }
 0x218   :  { %v2172_v23 = vpack.c.bf16 %v419_v11, %v417_v9  ;;  %v404_v26 = vmul.f32 %v2793_v55, %v384_v7  ;;  %v406_v33 = vmul.f32 %v2793_v55, %v386_v15  ;;  %v372_v34 = vmul.f32 %v2788_v42, %v352_v16  ;;  %v601_v9 = vld [vmem:[%s3300_s9 + $0x8] sm:$0xff]  ;;  %v474_v11 = vld [vmem:[#allocation8 + $0x40] sm:$0xff] }
 0x219   :  { %v2174_v30 = vpack.c.bf16 %v418_v17, %v416_v14  ;;  %v2176_v31 = vpack.c.bf16 %v423_v19, %v421_v18  ;;  %v374_v38 = vmul.f32 %v2788_v42, %v354_v20  ;;  %v409_v39 = vmul.f32 %v2793_v55, %v389_v21  ;;  %v475_v18 = vld [vmem:[#allocation8 + $0x48] sm:$0xff]  ;;  %v490_v19 = vld [vmem:[#allocation8] sm:$0xff] }
 0x21a   :  { %2173 = vmatprep.subr.bf16.mxu0 %v2172_v23  ;;  %v420_v37 = vadd.f32 %v404_v26, %v367_v24  ;;  %v411_v40 = vmul.f32 %v2793_v55, %v391_v22  ;;  %v422_v44 = vadd.f32 %v406_v33, %v369_v25  ;;  %v371_v45 = vmul.f32 %v2788_v42, %v351_v27  ;;  %v491_v20 = vld [vmem:[#allocation8 + $0x8] sm:$0xff]  ;;  %v476_v24 = vld [vmem:[#allocation8 + $0x50] sm:$0xff]  ;;  %v477_v25 = vld [vmem:[#allocation8 + $0x58] sm:$0xff] }
 0x21b   :  { %2175 = vmatpush1.bf16.msra.mxu0 %v2174_v30  ;;  %v373_v46 = vmul.f32 %v2788_v42, %v353_v28  ;;  %v408_v47 = vmul.f32 %v2793_v55, %v388_v29  ;;  %v425_v50 = vadd.f32 %v409_v39, %v372_v34  ;;  %v410_v56 = vmul.f32 %v2793_v55, %v390_v35  ;;  %v492_v30 = vld [vmem:[#allocation8 + $0x10] sm:$0xff]  ;;  %v494_v39 = vld [vmem:[#allocation8 + $0x20] sm:$0xff] }
 0x21c   :  { %2177 = vmatprep.subr.bf16.mxu0 %v2176_v31  ;;  %v427_v53 = vadd.f32 %v411_v40, %v374_v38  ;;  %v376_v57 = vmul.f32 %v2788_v42, %v356_v36  ;;  %v2178_v62 = vpack.c.bf16 %v422_v44, %v420_v37  ;;  %v378_v1 = vmul.f32 %v2788_v42, %v358_v41  ;;  %v493_v31 = vld [vmem:[#allocation8 + $0x18] sm:$0xff]  ;;  %v478_v37 = vld [vmem:[#allocation8 + $0x60] sm:$0xff]  ;;  %v479_v38 = vld [vmem:[#allocation8 + $0x68] sm:$0xff] }
 0x21d   :  { %v424_v63 = vadd.f32 %v408_v47, %v371_v45  ;;  %v413_v2 = vmul.f32 %v2793_v55, %v393_v43  ;;  %v426_v5 = vadd.f32 %v410_v56, %v373_v46  ;;  %v415_v6 = vmul.f32 %v2793_v55, %v395_v48  ;;  %v495_v44 = vld [vmem:[#allocation8 + $0x28] sm:$0xff] }
 0x21e   :  { %v2180_v4 = vpack.c.bf16 %v427_v53, %v425_v50  ;;  %v375_v7 = vmul.f32 %v2788_v42, %v355_v49  ;;  %v377_v15 = vmul.f32 %v2788_v42, %v357_v59  ;;  %v412_v16 = vmul.f32 %v2793_v55, %v392_v60  ;;  %v480_v49 = vld [vmem:[#allocation8 + $0x70] sm:$0xff]  ;;  %v481_v50 = vld [vmem:[#allocation8 + $0x78] sm:$0xff] }
 0x21f   :  { %2179 = vmatpush1.bf16.msra.mxu0 %v2178_v62  ;;  %v429_v14 = vadd.f32 %v413_v2, %v376_v57  ;;  %v414_v17 = vmul.f32 %v2793_v55, %v394_v61  ;;  %v2182_v21 = vpack.c.bf16 %v426_v5, %v424_v63  ;;  %v431_v22 = vadd.f32 %v415_v6, %v378_v1  ;;  %v496_v53 = vld [vmem:[#allocation8 + $0x30] sm:$0xff]  ;;  %v497_v61 = vld [vmem:[#allocation8 + $0x38] sm:$0xff] }
 0x220   :  { %2181 = vmatprep.subr.bf16.mxu0 %v2180_v4  ;;  %v599_v23 = vmul.f32 %v1910_v3, %v2788_v42  ;;  %v428_v26 = vadd.f32 %v412_v16, %v375_v7  ;;  %v603_v28 = vmul.f32 %v601_v9, %v2793_v55  ;;  %v482_v29 = vmul.f32 %v474_v11, %v2788_v42  ;;  %v1885_v62 = vld [vmem:[%s3297_s6 + $0x40] sm:$0xff]  ;;  %v1886_v4 = vld [vmem:[%s3297_s6 + $0x48] sm:$0xff]  ;;  %v1888_v16 = vld [vmem:[%s3297_s6 + $0x58] sm:$0xff] }
 0x221   :  { %v430_v27 = vadd.f32 %v414_v17, %v377_v15  ;;  %v2184_v33 = vpack.c.bf16 %v431_v22, %v429_v14  ;;  %v483_v34 = vmul.f32 %v475_v18, %v2788_v42  ;;  %v498_v35 = vmul.f32 %v490_v19, %v2793_v55  ;;  %v449_v5 = vld [vmem:[%s3297_s6] sm:$0xff]  ;;  %v450_v6 = vld [vmem:[%s3297_s6 + $0x8] sm:$0xff]  ;;  %v1887_v15 = vld [vmem:[%s3297_s6 + $0x50] sm:$0xff] }
 0x222   :  { %v499_v36 = vmul.f32 %v491_v20, %v2793_v55  ;;  %v2840_v40 = vadd.f32 %v603_v28, %v599_v23  ;;  %v484_v41 = vmul.f32 %v476_v24, %v2788_v42  ;;  %v485_v43 = vmul.f32 %v477_v25, %v2788_v42  ;;  %v452_v22 = vld [vmem:[%s3297_s6 + $0x18] sm:$0xff]  ;;  %v1890_v28 = vld [vmem:[%s3297_s6 + $0x68] sm:$0xff] }
 0x223   :  { %2183 = vmatpush1.bf16.msra.mxu0 %v2182_v21  ;;  %v506_v45 = vadd.f32 %v498_v35, %v482_v29  ;;  %v500_v47 = vmul.f32 %v492_v30, %v2793_v55  ;;  %v501_v48 = vmul.f32 %v493_v31, %v2793_v55  ;;  %v2186_v56 = vpack.c.bf16 %v430_v27, %v428_v26  ;;  %v451_v21 = vld [vmem:[%s3297_s6 + $0x10] sm:$0xff]  ;;  %v1889_v27 = vld [vmem:[%s3297_s6 + $0x60] sm:$0xff]  ;;  %v2897_v30 = vld [vmem:[#allocation2 + $0x8] sm:$0xff] }
 0x224   :  { %2185 = vmatprep.subr.bf16.mxu0 %v2184_v33  ;;  %v507_v46 = vadd.f32 %v499_v36, %v483_v34  ;;  %v486_v57 = vmul.f32 %v478_v37, %v2788_v42  ;;  %v487_v59 = vmul.f32 %v479_v38, %v2788_v42  ;;  %v502_v60 = vmul.f32 %v494_v39, %v2793_v55  ;;  %v453_v29 = vld [vmem:[%s3297_s6 + $0x20] sm:$0xff]  ;;  %v454_v36 = vld [vmem:[%s3297_s6 + $0x28] sm:$0xff] }
 0x225   :  { %v508_v1 = vadd.f32 %v500_v47, %v484_v41  ;;  %v509_v2 = vadd.f32 %v501_v48, %v485_v43  ;;  %v503_v3 = vmul.f32 %v495_v44, %v2793_v55  ;;  %v488_v9 = vmul.f32 %v480_v49, %v2788_v42  ;;  %v1891_v41 = vld [vmem:[%s3297_s6 + $0x70] sm:$0xff]  ;;  %v1892_v43 = vld [vmem:[%s3297_s6 + $0x78] sm:$0xff]  ;;  %v1893_v49 = vld [vmem:[%s3299_s8 + $0x80] sm:$0xff] }
 0x226   :  { %v2852_v63 = vpack.c.bf16 %v507_v46, %v506_v45  ;;  %v510_v7 = vadd.f32 %v502_v60, %v486_v57  ;;  %v489_v11 = vmul.f32 %v481_v50, %v2788_v42  ;;  %v504_v14 = vmul.f32 %v496_v53, %v2793_v55  ;;  %v455_v44 = vld [vmem:[%s3297_s6 + $0x30] sm:$0xff]  ;;  %v456_v48 = vld [vmem:[%s3297_s6 + $0x38] sm:$0xff]  ;;  %v547_v60 = vld [vmem:[%s3299_s8] sm:$0xff] }
 0x227   :  { %2187 = vmatpush1.bf16.msra.mxu0 %v2186_v56  ;;  %v2873_v17 = vpack.c.bf16 %v509_v2, %v508_v1  ;;  %v511_v18 = vadd.f32 %v503_v3, %v487_v59  ;;  %v505_v19 = vmul.f32 %v497_v61, %v2793_v55  ;;  %v441_v20 = vmul.f32 %v1885_v62, %v2788_v42  ;;  %v1894_v59 = vld [vmem:[%s3299_s8 + $0x88] sm:$0xff] }
 0x228   :  { %v512_v23 = vadd.f32 %v504_v14, %v488_v9  ;;  %v442_v24 = vmul.f32 %v1886_v4, %v2788_v42  ;;  %v457_v25 = vmul.f32 %v449_v5, %v2793_v55  ;;  %v458_v26 = vmul.f32 %v450_v6, %v2793_v55  ;;  %v548_v61 = vld [vmem:[%s3299_s8 + $0x8] sm:$0xff]  ;;  %v1895_v4 = vld [vmem:[%s3299_s8 + $0x90] sm:$0xff]  ;;  %v1896_v5 = vld [vmem:[%s3299_s8 + $0x98] sm:$0xff] }
 0x229   :  { %v2899_v31 = vpack.c.bf16 %v511_v18, %v510_v7  ;;  %v513_v33 = vadd.f32 %v505_v19, %v489_v11  ;;  %v443_v34 = vmul.f32 %v1887_v15, %v2788_v42  ;;  %v444_v35 = vmul.f32 %v1888_v16, %v2788_v42  ;;  %v549_v14 = vld [vmem:[%s3299_s8 + $0x10] sm:$0xff]  ;;  %v550_v15 = vld [vmem:[%s3299_s8 + $0x18] sm:$0xff] }
 0x22a   :  { %1911 = vmatmul.mubr.msk.f32.vlgmr.msra.gmra.mrb[4].mxu0 %vm147_vm0, %v2710_v32  ;;  %v465_v37 = vadd.f32 %v457_v25, %v441_v20  ;;  %v466_v38 = vadd.f32 %v458_v26, %v442_v24  ;;  %v459_v39 = vmul.f32 %v451_v21, %v2793_v55  ;;  %v460_v32 = vmul.f32 %v452_v22, %v2793_v55  ;;  %v1897_v21 = vld [vmem:[%s3299_s8 + $0xa0] sm:$0xff]  ;;  %v1898_v22 = vld [vmem:[%s3299_s8 + $0xa8] sm:$0xff] }
 0x22b   :  { %687 = vmatprep.mubr.f32.mxu0 %v2518_v0  ;;  %v2918_v45 = vpack.c.bf16 %v513_v33, %v512_v23  ;;  %v445_v0 = vmul.f32 %v1889_v27, %v2788_v42  ;;  %v446_v46 = vmul.f32 %v1890_v28, %v2788_v42  ;;  %v461_v47 = vmul.f32 %v453_v29, %v2793_v55  ;;  %v551_v23 = vld [vmem:[%s3299_s8 + $0x20] sm:$0xff]  ;;  %v552_v28 = vld [vmem:[%s3299_s8 + $0x28] sm:$0xff] }
 0x22c   :  { %v2929_v50 = vpack.c.bf16 %v466_v38, %v465_v37  ;;  %v467_v53 = vadd.f32 %v459_v39, %v443_v34  ;;  %v468_v56 = vadd.f32 %v460_v32, %v444_v35  ;;  %v462_v57 = vmul.f32 %v454_v36, %v2793_v55  ;;  %v1899_v36 = vld [vmem:[%s3299_s8 + $0xb0] sm:$0xff]  ;;  %v1900_v37 = vld [vmem:[%s3299_s8 + $0xb8] sm:$0xff] }
 0x22d   :  { %v469_v62 = vadd.f32 %v461_v47, %v445_v0  ;;  %v447_v1 = vmul.f32 %v1891_v41, %v2788_v42  ;;  %v448_v2 = vmul.f32 %v1892_v43, %v2788_v42  ;;  %v463_v3 = vmul.f32 %v455_v44, %v2793_v55  ;;  %v553_v38 = vld [vmem:[%s3299_s8 + $0x30] sm:$0xff]  ;;  %v554_v44 = vld [vmem:[%s3299_s8 + $0x38] sm:$0xff]  ;;  %v1901_v0 = vld [vmem:[%s3299_s8 + $0xc0] sm:$0xff] }
 0x22e   :  { %1912 = vmatmul.mubr.msk.f32.gmra.mrb[6].mxu0 %vm147_vm0, %v2897_v30  ;;  %v2952_v6 = vpack.c.bf16 %v468_v56, %v467_v53  ;;  %v470_v7 = vadd.f32 %v462_v57, %v446_v46  ;;  %v464_v9 = vmul.f32 %v456_v48, %v2793_v55  ;;  %v531_v11 = vmul.f32 %v1893_v49, %v2788_v42  ;;  %v1902_v53 = vld [vmem:[%s3299_s8 + $0xc8] sm:$0xff]  ;;  %v555_v56 = vld [vmem:[%s3299_s8 + $0x40] sm:$0xff] }
 0x22f   :  { %v471_v16 = vadd.f32 %v463_v3, %v447_v1  ;;  %v532_v18 = vmul.f32 %v1894_v59, %v2788_v42  ;;  %v563_v19 = vmul.f32 %v547_v60, %v2793_v55  ;;  %v564_v20 = vmul.f32 %v548_v61, %v2793_v55  ;;  %v556_v57 = vld [vmem:[%s3299_s8 + $0x48] sm:$0xff]  ;;  %v1903_v1 = vld [vmem:[%s3299_s8 + $0xd0] sm:$0xff] }
 0x230   :  { %v2974_v24 = vpack.c.bf16 %v470_v7, %v469_v62  ;;  %v472_v25 = vadd.f32 %v464_v9, %v448_v2  ;;  %v533_v26 = vmul.f32 %v1895_v4, %v2788_v42  ;;  %v534_v27 = vmul.f32 %v1896_v5, %v2788_v42  ;;  %v1904_v2 = vld [vmem:[%s3299_s8 + $0xd8] sm:$0xff]  ;;  %v557_v9 = vld [vmem:[%s3299_s8 + $0x50] sm:$0xff] }
 0x231   :  { %v579_v29 = vadd.f32 %v563_v19, %v531_v11  ;;  %v580_v33 = vadd.f32 %v564_v20, %v532_v18  ;;  %v565_v34 = vmul.f32 %v549_v14, %v2793_v55  ;;  %v566_v35 = vmul.f32 %v550_v15, %v2793_v55  ;;  %v558_v11 = vld [vmem:[%s3299_s8 + $0x58] sm:$0xff]  ;;  %v1905_v19 = vld [vmem:[%s3299_s8 + $0xe0] sm:$0xff]  ;;  %v1906_v20 = vld [vmem:[%s3299_s8 + $0xe8] sm:$0xff] }
 0x232   :  { %v2992_v39 = vpack.c.bf16 %v472_v25, %v471_v16  ;;  %v535_v32 = vmul.f32 %v1897_v21, %v2788_v42  ;;  %v536_v41 = vmul.f32 %v1898_v22, %v2788_v42  ;;  %v567_v43 = vmul.f32 %v551_v23, %v2793_v55  ;;  %v559_v21 = vld [vmem:[%s3299_s8 + $0x60] sm:$0xff] }
 0x233   :  { %v3003_v46 = vpack.c.bf16 %v580_v33, %v579_v29  ;;  %v581_v47 = vadd.f32 %v565_v34, %v533_v26  ;;  %v582_v48 = vadd.f32 %v566_v35, %v534_v27  ;;  %v568_v49 = vmul.f32 %v552_v28, %v2793_v55  ;;  %v560_v27 = vld [vmem:[%s3299_s8 + $0x68] sm:$0xff]  ;;  %v1907_v35 = vld [vmem:[%s3299_s8 + $0xf0] sm:$0xff] }
 0x234   :  { %v583_v59 = vadd.f32 %v567_v43, %v535_v32  ;;  %v537_v60 = vmul.f32 %v1899_v36, %v2788_v42  ;;  %v538_v61 = vmul.f32 %v1900_v37, %v2788_v42  ;;  %v569_v62 = vmul.f32 %v553_v38, %v2793_v55  ;;  %v561_v36 = vld [vmem:[%s3299_s8 + $0x70] sm:$0xff]  ;;  %v1908_v43 = vld [vmem:[%s3299_s8 + $0xf8] sm:$0xff] }
 0x235   :  { %v3024_v3 = vpack.c.bf16 %v582_v48, %v581_v47  ;;  %v584_v4 = vadd.f32 %v568_v49, %v536_v41  ;;  %v570_v5 = vmul.f32 %v554_v44, %v2793_v55  ;;  %v539_v7 = vmul.f32 %v1901_v0, %v2788_v42  ;;  %v562_v44 = vld [vmem:[%s3299_s8 + $0x78] sm:$0xff]  ;;  %s2519_s8 = smov 64  }
 0x236   :  { %v585_v14 = vadd.f32 %v569_v62, %v537_v60  ;;  %v540_v15 = vmul.f32 %v1902_v53, %v2788_v42  ;;  %v571_v16 = vmul.f32 %v555_v56, %v2793_v55  ;;  %v572_v18 = vmul.f32 %v556_v57, %v2793_v55 }
 0x237   :  { %v3046_v22 = vpack.c.bf16 %v584_v4, %v583_v59  ;;  %v586_v23 = vadd.f32 %v570_v5, %v538_v61  ;;  %v541_v25 = vmul.f32 %v1903_v1, %v2788_v42  ;;  %v542_v26 = vmul.f32 %v1904_v2, %v2788_v42 }
 0x238   :  { %v587_v28 = vadd.f32 %v571_v16, %v539_v7  ;;  %v588_v29 = vadd.f32 %v572_v18, %v540_v15  ;;  %v573_v33 = vmul.f32 %v557_v9, %v2793_v55  ;;  %v574_v34 = vmul.f32 %v558_v11, %v2793_v55 }
 0x239   :  { %v3061_v37 = vpack.c.bf16 %v586_v23, %v585_v14  ;;  %v543_v38 = vmul.f32 %v1905_v19, %v2788_v42  ;;  %v544_v32 = vmul.f32 %v1906_v20, %v2788_v42  ;;  %v575_v41 = vmul.f32 %v559_v21, %v2793_v55 }
 0x23a   :  { %v3072_v0 = vpack.c.bf16 %v588_v29, %v587_v28  ;;  %v589_v47 = vadd.f32 %v573_v33, %v541_v25  ;;  %v590_v48 = vadd.f32 %v574_v34, %v542_v26  ;;  %v576_v49 = vmul.f32 %v560_v27, %v2793_v55  ;;  %v3123_v28 = vld [vmem:[%s3292_s1] sm:$0xff]  ;;  %v3128_v33 = vld [vmem:[%s3292_s1 + $0x8] sm:$0xff]  ;;  %s2524_s1 = smov 80  }
 0x23b   :  { %v591_v53 = vadd.f32 %v575_v41, %v543_v38  ;;  %v545_v56 = vmul.f32 %v1907_v35, %v2788_v42  ;;  %v577_v57 = vmul.f32 %v561_v36, %v2793_v55  ;;  %v546_v61 = vmul.f32 %v1908_v43, %v2788_v42 }
 0x23c   :  { %v3077_v59 = vpack.c.bf16 %v590_v48, %v589_v47  ;;  %v592_v60 = vadd.f32 %v576_v49, %v544_v32  ;;  %v578_v62 = vmul.f32 %v562_v44, %v2793_v55  ;;  %v609_v7 = vrot.slane %v2806_v12, %v2751_v52 }
 0x23d   :  { %v593_v1 = vadd.f32 %v577_v57, %v545_v56  ;;  %v613_v11 = vrot.slane %v2840_v40, %v2751_v52 }
 0x23e   :  { %v3081_v2 = vpack.c.bf16 %v592_v60, %v591_v53  ;;  %v594_v4 = vadd.f32 %v578_v62, %v546_v61 }
 0x240   :  { %v3083_v5 = vpack.c.bf16 %v594_v4, %v593_v1 }
 0x2fd   :  { %v683_v9 = vpop.f32.mrb[4].mxu0 }
 0x2fe   :  { %v3089_v14 = vadd.f32 %v683_v9, %v609_v7  ;;  %v685_v15 = vpop.f32.mrb[5].mxu0 }
 0x2ff   :  { %v686_v42 = vadd.f32 %v685_v15, %v613_v11 }
 0x300   :  { %2015 = vmatprep.mubr.msk.f32.mxu1 %vm700_vm3, %v3089_v14 }
 0x301   :  { %v689_v55 = vpop.f32.mrb[6].mxu0 }
 0x302   :  { %v3093_v16 = vadd.f32 %v689_v55, %v609_v7  ;;  %v691_v18 = vpop.f32.mrb[7].mxu0 }
 0x303   :  { %v692_v19 = vadd.f32 %v691_v18, %v613_v11 }
 0x304   :  { %v3097_v20 = vpack.i.bf16 %v3093_v16, %v3089_v14 }
 0x305   :  { %v2194_v21 = vpack.c.bf16 %v692_v19, %v686_v42  ;;  %v3099_v23 = vpack.i.bf16 %v692_v19, %v686_v42 }
 0x306   :  { %2313 = vrot.lane.b32.xlu0 %v3097_v20, %s2519_s8 }
 0x30a   :  { %887 = vrot.lane.b32.xlu0 %v3089_v14, %s2520_s30 }
 0x30e   :  { %2323 = vrot.lane.b32.xlu0 %v3097_v20, %s2521_s11 }
 0x312   :  { %1089 = vrot.lane.b32.xlu0 %v3089_v14, %s2522_s12 }
 0x378   :  { %v2314_v52 = vpop.permute.xlu0 %2313 }
 0x379   :  { %v2316_v40 = vunpack.i.h.bf16 %v2314_v52  ;;  %v2315_v25 = vunpack.i.l.bf16 %v2314_v52 }
 0x37b   :  { %v2188_v27 = vpack.c.bf16 %v2316_v40, %v2315_v25 }
 0x37c   :  { %v888_v11 = vpop.permute.xlu0 %887 }
 0x37d   :  { %2190 = vmatprep.subr.msk.bf16.mxu1 %vm3110_vm4, %v2188_v27 }
 0x37e   :  { %2193 = vmatpush3.bf16.xpose.msk.msra.mxu1 %vm3110_vm4, %v2188_v27 }
 0x37f   :  { %2195 = vmatprep.subr.bf16.mxu1 %v2194_v21 }
 0x380   :  { %v2324_v15 = vpop.permute.xlu0 %2323 }
 0x381   :  { %v2326_v18 = vunpack.i.h.bf16 %v2324_v15  ;;  %v2325_v19 = vunpack.i.l.bf16 %v2324_v15 }
 0x383   :  { %v2208_v40 = vpack.c.bf16 %v2326_v18, %v2325_v19 }
 0x384   :  { %v1090_v27 = vpop.permute.xlu0 %1089 }
 0x385   :  { %2016 = vmatmul.mubr.msk.f32.vlgmr.msra.gmra.mrb[0].mxu1 %vm700_vm3, %v3093_v16 }
 0x386   :  { %2197 = vmatpush3.bf16.msra.mxu1 %v2194_v21 }
 0x458   :  { %v2017_v29 = vpop.f32.mrb[0].mxu1 }
 0x459   :  { %v775_v34 = vpop.f32.mrb[1].mxu1  ;;  %v781_v36 = vadd.f32 %v2017_v29, %v3128_v33 }
 0x45a   :  { %v776_v35 = vadd.f32 %v775_v34, %v3123_v28 }
 0x45b   :  { %v787_v32 = vsel %vm700_vm3, %v781_v36, -inf }
 0x45c   :  { %v784_v38 = vsel %vm700_vm3, %v776_v35, -inf }
 0x45d   :  { %785 = vmax.xlane.f32.xlu1 %v784_v38 }
 0x461   :  { %788 = vmax.xlane.f32.xlu1 %v787_v32 }
 0x472   :  { %2318 = vrot.lane.b32.xlu1 %v3097_v20, %s2523_s18 }
 0x4ea   :  { %v786_v41 = vpop.xlane.xlu1 %785 }
 0x4eb   :  { %v790_v43 = vsub.f32 %v776_v35, %v786_v41 }
 0x4ed   :  { %v792_v48 = vmul.f32 1.442695, %v790_v43 }
 0x4ee   :  { %v789_v44 = vpop.xlane.xlu1 %788 }
 0x4ef   :  { %v791_v47 = vsub.f32 %v781_v36, %v789_v44 }
 0x4f1   :  { %v794_v49 = vmul.f32 1.442695, %v791_v47 }
 0x4f2   :  { %v2319_v53 = vpop.permute.xlu1 %2318 }
 0x4f3   :  { %2347 = vpow2.f32 %v794_v49  ;;  %v2321_v56 = vunpack.i.h.bf16 %v2319_v53  ;;  %v2320_v57 = vunpack.i.l.bf16 %v2319_v53 }
 0x4f4   :  { %2349 = vpow2.f32 %v792_v48 }
 0x4f5   :  { %v2198_v60 = vpack.c.bf16 %v2321_v56, %v2320_v57 }
 0x4f7   :  { %2200 = vmatprep.subr.msk.bf16.mxu1 %vm3110_vm4, %v2198_v60 }
 0x4fd   :  { %v2348_v61 = vpop.eup %2347 }
 0x4fe   :  { %v799_v62 = vsel %vm700_vm3, %v2348_v61, 0.0  ;;  %v2350_v1 = vpop.eup %2349 }
 0x4ff   :  { %800 = vadd.xlane.f32.xlu1 %v799_v62  ;;  %v796_v4 = vsel %vm700_vm3, %v2350_v1, 0.0 }
 0x503   :  { %797 = vadd.xlane.f32.xlu1 %v796_v4 }
 0x514   :  { %889 = vrot.lane.b32.xlu1 %v3093_v16, %s2520_s30 }
 0x518   :  { %1091 = vrot.lane.b32.xlu1 %v3093_v16, %s2522_s12 }
 0x58c   :  { %v801_v7 = vpop.xlane.xlu1 %800 }
 0x58d   :  { %2351 = vrcp.f32 %v801_v7 }
 0x590   :  { %v798_v9 = vpop.xlane.xlu1 %797 }
 0x591   :  { %2353 = vrcp.f32 %v798_v9 }
 0x594   :  { %v890_v25 = vpop.permute.xlu1 %889 }
 0x597   :  { %v2352_v42 = vpop.eup %2351 }
 0x598   :  { %v805_v52 = vmul.f32 %v2352_v42, %v2348_v61  ;;  %v1092_v29 = vpop.permute.xlu1 %1091 }
 0x59b   :  { %v2354_v55 = vpop.eup %2353 }
 0x59c   :  { %v804_v21 = vmul.f32 %v2354_v55, %v2350_v1 }
 0x59e   :  { %2022 = vmatprep.mubr.msk.f32.mxu1 %vm700_vm3, %v804_v21 }
 0x59f   :  { %2023 = vmatmul.mubr.msk.f32.vlgmr.msra.gmra.mrb[2].mxu1 %vm700_vm3, %v805_v52 }
 0x5a0   :  { %2203 = vmatpush3.bf16.xpose.msk.msra.mxu1 %vm3110_vm4, %v2198_v60  ;;  %2029 = vmatprep.mubr.msk.f32.mxu1 %vm700_vm3, %v888_v11 }
 0x5a1   :  { %2210 = vmatprep.subr.msk.bf16.mxu1 %vm3110_vm4, %v2208_v40 }
 0x5a7   :  { %2030 = vmatmul.mubr.msk.f32.vlgmr.msra.gmra.mrb[4].mxu1 %vm700_vm3, %v890_v25 }
 0x5a8   :  { %2213 = vmatpush3.bf16.xpose.msk.msra.mxu1 %vm3110_vm4, %v2208_v40  ;;  %2043 = vmatprep.mubr.msk.f32.mxu1 %vm700_vm3, %v1090_v27 }
 0x5af   :  { %2044 = vmatmul.mubr.msk.f32.vlgmr.msra.gmra.mrb[6].mxu1 %vm700_vm3, %v1092_v29 }
 0x672   :  { %v3156_v34 = vpop.f32.mrb[2].mxu1 }
 0x673   :  { %v3158_v35 = vpop.f32.mrb[3].mxu1 }
 0x67a   :  { %v2031_v36 = vpop.f32.mrb[4].mxu1 }
 0x67b   :  { %v975_v38 = vadd.f32 %v2031_v36, %v3128_v33  ;;  %v969_v32 = vpop.f32.mrb[5].mxu1 }
 0x67c   :  { %v970_v41 = vadd.f32 %v969_v32, %v3123_v28 }
 0x67d   :  { %v981_v43 = vsel %vm700_vm3, %v975_v38, -inf }
 0x67e   :  { %982 = vmax.xlane.f32.xlu1 %v981_v43  ;;  %v978_v44 = vsel %vm700_vm3, %v970_v41, -inf }
 0x67f   :  { %979 = vmax.xlane.f32.xlu0 %v978_v44 }
 0x682   :  { %v2045_v47 = vpop.f32.mrb[6].mxu1 }
 0x683   :  { %v1171_v48 = vpop.f32.mrb[7].mxu1  ;;  %v1177_v53 = vadd.f32 %v2045_v47, %v3128_v33 }
 0x684   :  { %v1172_v49 = vadd.f32 %v1171_v48, %v3123_v28 }
 0x685   :  { %v1183_v57 = vsel %vm700_vm3, %v1177_v53, -inf }
 0x686   :  { %v1180_v56 = vsel %vm700_vm3, %v1172_v49, -inf }
 0x687   :  { %1181 = vmax.xlane.f32.xlu0 %v1180_v56 }
 0x68b   :  { %1184 = vmax.xlane.f32.xlu0 %v1183_v57 }
 0x70b   :  { %v983_v60 = vpop.xlane.xlu1 %982 }
 0x70c   :  { %v985_v61 = vsub.f32 %v975_v38, %v983_v60  ;;  %v980_v62 = vpop.xlane.xlu0 %979 }
 0x70d   :  { %v984_v1 = vsub.f32 %v970_v41, %v980_v62 }
 0x70e   :  { %v988_v4 = vmul.f32 1.442695, %v985_v61 }
 0x70f   :  { %v986_v7 = vmul.f32 1.442695, %v984_v1 }
 0x710   :  { %2355 = vpow2.f32 %v988_v4 }
 0x711   :  { %2357 = vpow2.f32 %v986_v7 }
 0x714   :  { %v1182_v9 = vpop.xlane.xlu0 %1181 }
 0x715   :  { %v1186_v11 = vsub.f32 %v1172_v49, %v1182_v9 }
 0x717   :  { %v1188_v15 = vmul.f32 1.442695, %v1186_v11 }
 0x718   :  { %v1185_v42 = vpop.xlane.xlu0 %1184 }
 0x719   :  { %2359 = vpow2.f32 %v1188_v15  ;;  %v1187_v55 = vsub.f32 %v1177_v53, %v1185_v42 }
 0x71a   :  { %v2356_v18 = vpop.eup %2355 }
 0x71b   :  { %v2358_v19 = vpop.eup %2357  ;;  %v1190_v21 = vmul.f32 1.442695, %v1187_v55  ;;  %v993_v52 = vsel %vm700_vm3, %v2356_v18, 0.0 }
 0x71c   :  { %994 = vadd.xlane.f32.xlu1 %v993_v52  ;;  %v990_v40 = vsel %vm700_vm3, %v2358_v19, 0.0 }
 0x71d   :  { %2361 = vpow2.f32 %v1190_v21  ;;  %991 = vadd.xlane.f32.xlu0 %v990_v40 }
 0x723   :  { %v2360_v25 = vpop.eup %2359 }
 0x724   :  { %v1192_v27 = vsel %vm700_vm3, %v2360_v25, 0.0 }
 0x725   :  { %1193 = vadd.xlane.f32.xlu0 %v1192_v27 }
 0x727   :  { %v2362_v29 = vpop.eup %2361 }
 0x728   :  { %v1195_v36 = vsel %vm700_vm3, %v2362_v29, 0.0 }
 0x729   :  { %1196 = vadd.xlane.f32.xlu1 %v1195_v36 }
 0x73a   :  { %2333 = vrot.lane.b32.xlu1 %v3099_v23, %s2522_s12 }
 0x73b   :  { %2328 = vrot.lane.b32.xlu0 %v3099_v23, %s2520_s30 }
 0x73e   :  { %2338 = vrot.lane.b32.xlu1 %v3097_v20, %s2516_s16 }
 0x73f   :  { %1291 = vrot.lane.b32.xlu0 %v3093_v16, %s2524_s1 }
 0x742   :  { %1289 = vrot.lane.b32.xlu1 %v3089_v14, %s2524_s1 }
 0x7a9   :  { %v995_v32 = vpop.xlane.xlu1 %994 }
 0x7aa   :  { %v992_v38 = vpop.xlane.xlu0 %991 }
 0x7ab   :  { %2363 = vrcp.f32 %v992_v38 }
 0x7ac   :  { %2365 = vrcp.f32 %v995_v32 }
 0x7b2   :  { %v1194_v41 = vpop.xlane.xlu0 %1193 }
 0x7b3   :  { %2367 = vrcp.f32 %v1194_v41 }
 0x7b5   :  { %v2364_v43 = vpop.eup %2363 }
 0x7b6   :  { %v1197_v44 = vpop.xlane.xlu1 %1196  ;;  %v2329_v47 = vpop.permute.xlu0 %2328  ;;  %v998_v48 = vmul.f32 %v2364_v43, %v2358_v19 }
 0x7b7   :  { %2369 = vrcp.f32 %v1197_v44  ;;  %v2331_v49 = vunpack.i.h.bf16 %v2329_v47  ;;  %v2330_v20 = vunpack.i.l.bf16 %v2329_v47  ;;  %v2366_v16 = vpop.eup %2365 }
 0x7b8   :  { %2036 = vmatprep.mubr.msk.f32.mxu0 %vm700_vm3, %v998_v48  ;;  %v999_v61 = vmul.f32 %v2366_v16, %v2356_v18 }
 0x7b9   :  { %v2204_v53 = vpack.c.bf16 %v2331_v49, %v2330_v20 }
 0x7ba   :  { %v2334_v56 = vpop.permute.xlu1 %2333  ;;  %v1292_v18 = vpop.permute.xlu0 %1291 }
 0x7bb   :  { %v2336_v57 = vunpack.i.h.bf16 %v2334_v56  ;;  %v2335_v14 = vunpack.i.l.bf16 %v2334_v56  ;;  %2205 = vmatprep.subr.bf16.mxu0 %v2204_v53 }
 0x7bc   :  { %2207 = vmatpush3.bf16.msra.mxu0 %v2204_v53 }
 0x7bd   :  { %v2368_v60 = vpop.eup %2367  ;;  %v2214_v62 = vpack.c.bf16 %v2336_v57, %v2335_v14 }
 0x7be   :  { %v2339_v1 = vpop.permute.xlu1 %2338  ;;  %v1200_v4 = vmul.f32 %v2368_v60, %v2360_v25 }
 0x7bf   :  { %v2341_v7 = vunpack.i.h.bf16 %v2339_v1  ;;  %v2340_v9 = vunpack.i.l.bf16 %v2339_v1  ;;  %2037 = vmatmul.mubr.msk.f32.vlgmr.msra.gmra.mrb[8].mxu0 %vm700_vm3, %v999_v61  ;;  %2215 = vmatprep.subr.bf16.mxu0 %v2214_v62 }
 0x7c0   :  { %2217 = vmatpush3.bf16.msra.mxu0 %v2214_v62  ;;  %2050 = vmatprep.mubr.msk.f32.mxu0 %vm700_vm3, %v1200_v4 }
 0x7c1   :  { %v2370_v11 = vpop.eup %2369  ;;  %v2218_v15 = vpack.c.bf16 %v2341_v7, %v2340_v9 }
 0x7c2   :  { %v1201_v42 = vmul.f32 %v2370_v11, %v2362_v29  ;;  %v1290_v55 = vpop.permute.xlu1 %1289 }
 0x7c3   :  { %2220 = vmatprep.subr.msk.bf16.mxu0 %vm3110_vm4, %v2218_v15 }
 0x7c4   :  { %2051 = vmatmul.mubr.msk.f32.vlgmr.msra.gmra.mrb[10].mxu0 %vm700_vm3, %v1201_v42 }
 0x7c5   :  { %2057 = vmatprep.mubr.msk.f32.mxu0 %vm700_vm3, %v1290_v55 }
 0x7c9   :  { %2223 = vmatpush3.bf16.xpose.msk.msra.mxu0 %vm3110_vm4, %v2218_v15 }
 0x7ca   :  { %2245 = vmatprep.subr.bf16.mxu0 %v2852_v63 }
 0x7d0   :  { %2058 = vmatmul.mubr.msk.f32.vlgmr.msra.gmra.mrb[12].mxu0 %vm700_vm3, %v1292_v18 }
 0x7d1   :  { %2247 = vmatpush3.bf16.msra.mxu0 %v2852_v63 }
 0x7d2   :  { %2249 = vmatprep.subr.bf16.mxu0 %v2873_v17 }
 0x7d5   :  { %2251 = vmatpush3.bf16.msra.mxu0 %v2873_v17 }
 0x7d6   :  { %2253 = vmatprep.subr.bf16.mxu0 %v2899_v31 }
 0x7d9   :  { %2255 = vmatpush3.bf16.msra.mxu0 %v2899_v31 }
 0x7da   :  { %2257 = vmatprep.subr.bf16.mxu0 %v2918_v45 }
 0x7dd   :  { %2259 = vmatpush3.bf16.msra.mxu0 %v2918_v45 }
 0x892   :  { %v2038_v26 = vpop.f32.mrb[8].mxu0 }
 0x893   :  { %v1080_v19 = vpop.f32.mrb[9].mxu0 }
 0x897   :  { %v2052_v21 = vpop.f32.mrb[10].mxu0 }
 0x898   :  { %v1280_v52 = vpop.f32.mrb[11].mxu0 }
 0x8a3   :  { %v2059_v40 = vpop.f32.mrb[12].mxu0 }
 0x8a4   :  { %v1377_v25 = vadd.f32 %v2059_v40, %v3128_v33  ;;  %v1371_v63 = vpop.f32.mrb[13].mxu0 }
 0x8a5   :  { %v1372_v27 = vadd.f32 %v1371_v63, %v3123_v28 }
 0x8a6   :  { %v1383_v17 = vsel %vm700_vm3, %v1377_v25, -inf }
 0x8a7   :  { %1384 = vmax.xlane.f32.xlu0 %v1383_v17  ;;  %v1380_v29 = vsel %vm700_vm3, %v1372_v27, -inf }
 0x8a8   :  { %1381 = vmax.xlane.f32.xlu1 %v1380_v29 }
 0x8b9   :  { %2343 = vrot.lane.b32.xlu1 %v3099_v23, %s2524_s1 }
 0x8bd   :  { %1493 = vrot.lane.b32.xlu1 %v2038_v26, %s2516_s16 }
 0x8c1   :  { %1499 = vrot.lane.b32.xlu1 %v1280_v52, %s2521_s11 }
 0x8c5   :  { %1501 = vrot.lane.b32.xlu1 %v2052_v21, %s2521_s11 }
 0x934   :  { %v1385_v31 = vpop.xlane.xlu0 %1384 }
 0x935   :  { %v1387_v45 = vsub.f32 %v1377_v25, %v1385_v31  ;;  %v1382_v33 = vpop.xlane.xlu1 %1381 }
 0x936   :  { %v1386_v36 = vsub.f32 %v1372_v27, %v1382_v33  ;;  %v1643_v33 = vsub.s32 5, %v2748_v51 }
 0x937   :  { %v1390_v28 = vmul.f32 1.442695, %v1387_v45 }
 0x938   :  { %v1388_v38 = vmul.f32 1.442695, %v1386_v36 }
 0x939   :  { %v2344_v32 = vpop.permute.xlu1 %2343 }
 0x93a   :  { %2371 = vpow2.f32 %v1388_v38  ;;  %v2346_v41 = vunpack.i.h.bf16 %v2344_v32  ;;  %v2345_v43 = vunpack.i.l.bf16 %v2344_v32 }
 0x93b   :  { %2373 = vpow2.f32 %v1390_v28  ;;  %v1638_v28 = vrot.slane %v2806_v12, %v137_v8 }
 0x93c   :  { %v2224_v44 = vpack.c.bf16 %v2346_v41, %v2345_v43  ;;  %v1644_v41 = vrot.slane %v2806_v12, %v1643_v33 }
 0x93e   :  { %2225 = vmatprep.subr.bf16.mxu1 %v2224_v44 }
 0x93f   :  { %2227 = vmatpush3.bf16.msra.mxu1 %v2224_v44 }
 0x940   :  { %2229 = vmatprep.subr.bf16.mxu1 %v2929_v50 }
 0x944   :  { %v2372_v23 = vpop.eup %2371 }
 0x945   :  { %v1392_v47 = vsel %vm700_vm3, %v2372_v23, 0.0  ;;  %v2374_v48 = vpop.eup %2373 }
 0x946   :  { %1393 = vadd.xlane.f32.xlu0 %v1392_v47  ;;  %v1395_v49 = vsel %vm700_vm3, %v2374_v48, 0.0 }
 0x94a   :  { %1396 = vadd.xlane.f32.xlu0 %v1395_v49  ;;  %v1650_v49 = vrot.slane %v2806_v12, %v2757_v54  ;;  %v1745_v54 = vrot.slane %v2806_v12, %v313_v13 }
 0x960   :  { %1491 = vrot.lane.b32.xlu0 %v1080_v19, %s2516_s16  ;;  %s2525_s16 = smov [#allocation10]  }
 0x961   :  { %s1868_s19 = sshll.u32 %s2525_s16, 4  ;;  %s1869_s19 = int_to_ptr.vmem [resolvable:$true] %s1868_s19 }
 0x962   :  { %s2480_s21 = scalar_lea.vmem %s1869_s19, 256  ;;  %p2485_p5 = scmp.lt.s32.totalorder %s1869_s19, %s1869_s19 }
 0x963   :  { %p2481_p4 = scmp.ne.s32.totalorder %s1869_s19, %s2480_s21  ;;  %p2486_p6 = scmp.lt.s32.totalorder %s2480_s21, %s2480_s21 }
 0x965   :  { %p2487_p7 = por %p2486_p6, %p2485_p5 }
 0x967   :  { %p2488_p8 = pnand %p2487_p7, %p2481_p4 }
 0x9d3   :  { %v1394_v20 = vpop.xlane.xlu0 %1393 }
 0x9d4   :  { %2375 = vrcp.f32 %v1394_v20 }
 0x9d7   :  { %v1397_v53 = vpop.xlane.xlu0 %1396 }
 0x9d8   :  { %2377 = vrcp.f32 %v1397_v53 }
 0x9db   :  { %v1492_v1 = vpop.permute.xlu0 %1491 }
 0x9dc   :  { %v1513_v4 = vsel %vm700_vm3, %v3158_v35, %v1492_v1  ;;  %v2391_v35 = vld [vmem:[#allocation2] sm:$0xff] }
 0x9de   :  { %v2376_v16 = vpop.eup %2375 }
 0x9df   :  { %v1400_v56 = vmul.f32 %v2376_v16, %v2372_v23 }
 0x9e1   :  { %2064 = vmatprep.mubr.msk.f32.mxu1 %vm700_vm3, %v1400_v56 }
 0x9e2   :  { %v2378_v57 = vpop.eup %2377 }
 0x9e3   :  { %v1401_v14 = vmul.f32 %v2378_v57, %v2374_v48 }
 0x9e5   :  { %2065 = vmatmul.mubr.msk.f32.vlgmr.msra.gmra.mrb[8].mxu1 %vm700_vm3, %v1401_v14 }
 0x9e6   :  { %2231 = vmatpush3.bf16.msra.mxu1 %v2929_v50  ;;  %v1494_v50 = vpop.permute.xlu1 %1493 }
 0x9e7   :  { %2233 = vmatprep.subr.bf16.mxu1 %v2952_v6 }
 0x9ea   :  { %2235 = vmatpush3.bf16.msra.mxu1 %v2952_v6  ;;  %v1500_v62 = vpop.permute.xlu1 %1499 }
 0x9eb   :  { %2237 = vmatprep.subr.bf16.mxu1 %v2974_v24  ;;  %v1516_v7 = vsel %vm1515_vm5, %v1513_v4, %v1500_v62 }
 0x9ee   :  { %2239 = vmatpush3.bf16.msra.mxu1 %v2974_v24  ;;  %v1502_v6 = vpop.permute.xlu1 %1501 }
 0x9ef   :  { %2241 = vmatprep.subr.bf16.mxu1 %v2992_v39 }
 0x9f2   :  { %2243 = vmatpush3.bf16.msra.mxu1 %v2992_v39  ;;  %v1514_v39 = vsel %vm700_vm3, %v3156_v34, %v1494_v50 }
 0x9f3   :  { %2261 = vmatprep.subr.bf16.mxu1 %v3003_v46  ;;  %v1517_v11 = vsel %vm1515_vm5, %v1514_v39, %v1502_v6 }
 0xab8   :  { %v2066_v60 = vpop.f32.mrb[8].mxu1 }
 0xab9   :  { %1509 = vrot.lane.b32.xlu1 %v2066_v60, %s2523_s18  ;;  %v1480_v61 = vpop.f32.mrb[9].mxu1 }
 0xaba   :  { %1507 = vrot.lane.b32.xlu0 %v1480_v61, %s2523_s18 }
 0xb2b   :  { %v1510_v24 = vpop.permute.xlu1 %1509 }
 0xb2c   :  { %v1508_v9 = vpop.permute.xlu0 %1507  ;;  %v1520_v42 = vsel %vm1518_vm6, %v1517_v11, %v1510_v24 }
 0xb2d   :  { %v1519_v15 = vsel %vm1518_vm6, %v1516_v7, %v1508_v9 }
 0xb2e   :  { %2083 = vmatprep.mubr.msk.f32.mxu1 %vm147_vm0, %v1519_v15 }
 0xb2f   :  { %2084 = vmatmul.mubr.msk.f32.vlgmr.msra.gmra.mrb[10].mxu1 %vm147_vm0, %v1520_v42 }
 0xb30   :  { %2263 = vmatpush3.bf16.msra.mxu1 %v3003_v46  ;;  %v1524_v46 = vrot.slane %v2806_v12, %v2762_v58 }
 0xb31   :  { %2265 = vmatprep.subr.bf16.mxu1 %v3024_v3 }
 0xb34   :  { %2267 = vmatpush3.bf16.msra.mxu1 %v3024_v3 }
 0xb35   :  { %2269 = vmatprep.subr.bf16.mxu1 %v3046_v22 }
 0xb38   :  { %2271 = vmatpush3.bf16.msra.mxu1 %v3046_v22 }
 0xb39   :  { %2273 = vmatprep.subr.bf16.mxu1 %v3061_v37 }
 0xb3c   :  { %2275 = vmatpush3.bf16.msra.mxu1 %v3061_v37 }
 0xb3d   :  { %2277 = vmatprep.subr.bf16.mxu1 %v3072_v0 }
 0xb40   :  { %2279 = vmatpush3.bf16.msra.mxu1 %v3072_v0 }
 0xb41   :  { %2281 = vmatprep.subr.bf16.mxu1 %v3077_v59 }
 0xb44   :  { %2283 = vmatpush3.bf16.msra.mxu1 %v3077_v59 }
 0xb45   :  { %2285 = vmatprep.subr.bf16.mxu1 %v3081_v2 }
 0xb48   :  { %2287 = vmatpush3.bf16.msra.mxu1 %v3081_v2 }
 0xb49   :  { %2289 = vmatprep.subr.bf16.mxu1 %v3083_v5 }
 0xb4c   :  { %2291 = vmatpush3.bf16.msra.mxu1 %v3083_v5 }
 0xc02   :  { %v2085_v3 = vpop.f32.mrb[10].mxu1 }
 0xc03   :  { %v1603_v22 = vadd.f32 %v2085_v3, %v1524_v46  ;;  %v1597_v37 = vpop.f32.mrb[11].mxu1 }
 0xc04   :  { %v1598_v34 = vadd.f32 %v1597_v37, %v1524_v46 }
 0xc05   :  { %v1607_v0 = vadd.f32 %v1603_v22, %v2897_v30 }
 0xc06   :  { %v1606_v55 = vadd.f32 %v2391_v35, %v1598_v34 }
 0xc07   :  { %v1611_v59 = vsel %vm147_vm0, %v1607_v0, 0.0 }
 0xc08   :  { %1612 = vadd.xlane.f32.xlu1 %v1611_v59  ;;  %v1608_v2 = vsel %vm147_vm0, %v1606_v55, 0.0 }
 0xc09   :  { %1609 = vadd.xlane.f32.xlu0 %v1608_v2 }
 0xc95   :  { %v1613_v18 = vpop.xlane.xlu1 %1612 }
 0xc96   :  { %v1616_v26 = vmul.f32 0.015625, %v1613_v18  ;;  %v1610_v5 = vpop.xlane.xlu0 %1609 }
 0xc97   :  { %v1615_v19 = vmul.f32 0.015625, %v1610_v5 }
 0xc98   :  { %v1618_v21 = vsub.f32 %v1607_v0, %v1616_v26 }
 0xc99   :  { %v1617_v58 = vsub.f32 %v1606_v55, %v1615_v19 }
 0xc9a   :  { %v1620_v25 = vmul.f32 %v1618_v21, %v1618_v21 }
 0xc9b   :  { %v1619_v52 = vmul.f32 %v1617_v58, %v1617_v58 }
 0xc9c   :  { %v1624_v30 = vsel %vm147_vm0, %v1620_v25, 0.0 }
 0xc9d   :  { %v1621_v40 = vsel %vm147_vm0, %v1619_v52, 0.0  ;;  %v1857_v52 = vsub.s32 7, %v2748_v51 }
 0xc9e   :  { %1622 = vadd.xlane.f32.xlu0 %v1621_v40 }
 0xca2   :  { %1625 = vadd.xlane.f32.xlu0 %v1624_v30  ;;  %v1852_v30 = vrot.slane %v2806_v12, %v141_v10 }
 0xd2b   :  { %v1623_v63 = vpop.xlane.xlu0 %1622 }
 0xd2c   :  { %v1627_v27 = vmul.f32 0.015625, %v1623_v63 }
 0xd2e   :  { %v1629_v17 = vadd.f32 1e-12, %v1627_v27 }
 0xd2f   :  { %v1626_v29 = vpop.xlane.xlu0 %1625 }
 0xd30   :  { %2379 = vrsqrt.f32 %v1629_v17  ;;  %v1628_v31 = vmul.f32 0.015625, %v1626_v29  ;;  %v1858_v29 = vrot.slane %v2806_v12, %v1857_v52 }
 0xd32   :  { %v1630_v45 = vadd.f32 1e-12, %v1628_v31 }
 0xd34   :  { %2381 = vrsqrt.f32 %v1630_v45 }
 0xd3a   :  { %v2380_v36 = vpop.eup %2379 }
 0xd3b   :  { %v1633_v38 = vmul.f32 %v2380_v36, %v1617_v58 }
 0xd3d   :  { %v1639_v32 = vmul.f32 %v1638_v28, %v1633_v38 }
 0xd3e   :  { %v2382_v43 = vpop.eup %2381 }
 0xd3f   :  { %v1634_v44 = vmul.f32 %v2382_v43, %v1618_v21  ;;  %v1645_v23 = vadd.f32 %v1644_v41, %v1639_v32 }
 0xd41   :  { %v1640_v47 = vmul.f32 %v1638_v28, %v1634_v44  ;;  %2102 = vmatprep.mubr.msk.f32.mxu0 %vm147_vm0, %v1645_v23 }
 0xd43   :  { %v1646_v48 = vadd.f32 %v1644_v41, %v1640_v47 }
 0xd45   :  { %2103 = vmatmul.mubr.msk.f32.vlgmr.msra.gmra.mrb[14].mxu0 %vm147_vm0, %v1646_v48 }
 0xe18   :  { %v2104_v20 = vpop.f32.mrb[14].mxu0 }
 0xe19   :  { %v1729_v53 = vadd.f32 %v2104_v20, %v1650_v49  ;;  %v1723_v16 = vpop.f32.mrb[15].mxu0 }
 0xe1a   :  { %v1724_v8 = vadd.f32 %v1723_v16, %v1650_v49 }
 0xe1b   :  { %v1735_v56 = vmul.f32 0.70710677, %v1729_v53  ;;  %v1733_v1 = vmul.f32 0.5, %v1729_v53 }
 0xe1c   :  { %v1734_v57 = vmul.f32 0.70710677, %v1724_v8  ;;  %v1732_v50 = vmul.f32 0.5, %v1724_v8 }
 0xe1d   :  { %2383 = verf.f32 %v1735_v56 }
 0xe1e   :  { %2385 = verf.f32 %v1734_v57 }
 0xe27   :  { %v2384_v14 = vpop.eup %2383 }
 0xe28   :  { %v2386_v60 = vpop.eup %2385  ;;  %v1739_v61 = vadd.f32 1.0, %v2384_v14 }
 0xe29   :  { %v1738_v62 = vadd.f32 1.0, %v2386_v60 }
 0xe2a   :  { %v1741_v4 = vmul.f32 %v1739_v61, %v1733_v1 }
 0xe2b   :  { %v1740_v6 = vmul.f32 %v1738_v62, %v1732_v50 }
 0xe2d   :  { %2137 = vmatprep.mubr.f32.mxu1 %v1740_v6 }
 0xe2e   :  { %2138 = vmatmul.mubr.f32.vlgmr.msra.gmra.mrb[12].mxu1 %v1741_v4 }
 0xf01   :  { %v2139_v24 = vpop.f32.mrb[12].mxu1 }
 0xf02   :  { %v1818_v39 = vadd.f32 %v2139_v24, %v1745_v54  ;;  %v1812_v7 = vpop.f32.mrb[13].mxu1 }
 0xf03   :  { %v1813_v9 = vadd.f32 %v1812_v7, %v1745_v54 }
 0xf04   :  { %v1822_v11 = vadd.f32 %v1818_v39, %v1646_v48 }
 0xf05   :  { %v1821_v15 = vadd.f32 %v1813_v9, %v1645_v23 }
 0xf06   :  { %v1826_v42 = vsel %vm147_vm0, %v1822_v11, 0.0 }
 0xf07   :  { %1827 = vadd.xlane.f32.xlu1 %v1826_v42  ;;  %v1823_v46 = vsel %vm147_vm0, %v1821_v15, 0.0 }
 0xf08   :  { %1824 = vadd.xlane.f32.xlu0 %v1823_v46 }
 0xf94   :  { %v1828_v3 = vpop.xlane.xlu1 %1827 }
 0xf95   :  { %v1830_v22 = vmul.f32 0.015625, %v1828_v3  ;;  %v1825_v37 = vpop.xlane.xlu0 %1824 }
 0xf96   :  { %v1829_v34 = vmul.f32 0.015625, %v1825_v37 }
 0xf97   :  { %v1832_v0 = vsub.f32 %v1822_v11, %v1830_v22 }
 0xf98   :  { %v1831_v35 = vsub.f32 %v1821_v15, %v1829_v34 }
 0xf99   :  { %v1834_v55 = vmul.f32 %v1832_v0, %v1832_v0 }
 0xf9a   :  { %v1833_v13 = vmul.f32 %v1831_v35, %v1831_v35 }
 0xf9b   :  { %v1838_v59 = vsel %vm147_vm0, %v1834_v55, 0.0 }
 0xf9c   :  { %1839 = vadd.xlane.f32.xlu1 %v1838_v59  ;;  %v1835_v2 = vsel %vm147_vm0, %v1833_v13, 0.0 }
 0xf9d   :  { %1836 = vadd.xlane.f32.xlu0 %v1835_v2 }
0x1029   :  { %v1840_v18 = vpop.xlane.xlu1 %1839 }
0x102a   :  { %v1842_v26 = vmul.f32 0.015625, %v1840_v18  ;;  %v1837_v5 = vpop.xlane.xlu0 %1836 }
0x102b   :  { %v1841_v19 = vmul.f32 0.015625, %v1837_v5 }
0x102c   :  { %v1844_v21 = vadd.f32 1e-12, %v1842_v26 }
0x102d   :  { %v1843_v58 = vadd.f32 1e-12, %v1841_v19 }
0x102e   :  { %2387 = vrsqrt.f32 %v1844_v21 }
0x102f   :  { %2389 = vrsqrt.f32 %v1843_v58 }
0x1038   :  { %v2388_v40 = vpop.eup %2387 }
0x1039   :  { %v2390_v25 = vpop.eup %2389  ;;  %v1848_v63 = vmul.f32 %v2388_v40, %v1832_v0 }
0x103a   :  { %v1847_v27 = vmul.f32 %v2390_v25, %v1831_v35 }
0x103b   :  { %v1854_v17 = vmul.f32 %v1852_v30, %v1848_v63 }
0x103c   :  { %v1853_v31 = vmul.f32 %v1852_v30, %v1847_v27 }
0x103d   :  { %v1860_v45 = vadd.f32 %v1858_v29, %v1854_v17 }
0x103e   :  { %v1859_v33 = vadd.f32 %v1858_v29, %v1853_v31 }
0x103f   :  { %1862 = vst.msk [vmem:[#allocation10 + $0x8] sm:$0xff] %vm147_vm0, %v1860_v45 }
0x1040   :  { %1861 = vst.msk [vmem:[#allocation10] sm:$0xff] %vm147_vm0, %v1859_v33 }
0x1041   :  { %2491 = shalt.err (!%p2488_p8)
}
0x1042   :  { %s2492_s5 = scalar_lea.hbm %s3301_s10, 256 }
0x1043   :  { %p2493_p9 = scmp.ne.s32.totalorder %s3301_s10, %s2492_s5  ;;  %p2496_p10 = scmp.lt.u32.totalorder %s2492_s5, %s3301_s10 }
0x1045   :  { %p2498_p11 = pnand %p2496_p10, %p2493_p9 }
0x1047   :  { %2501 = shalt.err (!%p2498_p11)
}
0x1048   :  { %1874 = dma.vmem_to_hbm [thread:$0]  %s1869_s19, 256, %s3301_s10, [#allocation4], %s2512_s3, %s2512_s3, %s2513_s14  }
0x1049   :  { %2508 = dma.done.wait [#allocation4], 256  }
0x104a   :  { %2509 = vsyncadd [#allocation4], 4294967040 }
0x104b   :  { %1878 = vsyncpa [#allocation3], 1 }
0x104c   :  { %1879 = vsyncpa [#allocation6], 1 }
0x104d   :  { %1880 = vsyncpa [#allocation9], 1 }
0x104e   :  { %1881 = vsyncpa [#allocation4], 1 }

</bundles_post_ra>
